<compile_context>
chip_gen: v5e
topology: v5e:2x2
jax: 0.10.0
libtpu: 0.0.40
codegen_flags: <defaults>
</compile_context>

<pallas_src>
import functools

import jax
import jax.numpy as jnp
import numpy as np
from jax.experimental import pallas as pl
from jax.experimental.pallas import tpu as pltpu


def _program_encoder_kernel(B, T, H, NA, NO, NI,
                            lengths_ref, act_ref, obj_ref, noi_ref,
                            aemb_ref, oemb_ref, noise_ref,
                            w1a_ref, w1b_ref, w1c_ref, b1_ref, w2_ref, b2_ref,
                            wih0_ref, bih0_ref,
                            wl1_ref, bhh0_ref, bih1_ref, whh1_ref, bhh1_ref,
                            emb_out_ref, sketch_out_ref, xproj_ref):
    f32 = jnp.float32
    bf16 = jnp.bfloat16
    TB = T * B
    H3 = 3 * H

    # ---------------- embedding gathers (exact one-hot matmuls) ----------------
    def onehot_gather(idx_col, rows, n, table):
        iota = jax.lax.broadcasted_iota(jnp.int32, (rows, n), 1)
        onehot = (idx_col == iota).astype(f32)                          # [rows, n]
        return jnp.dot(onehot, table, preferred_element_type=f32)       # [rows, E]

    act_e = onehot_gather(act_ref[...], TB, NA, aemb_ref[...])          # [T*B, E]
    obj_e = onehot_gather(obj_ref[...], 2 * TB, NO, oemb_ref[...])      # [2*T*B, E]
    noi_e = onehot_gather(noi_ref[...], 2 * TB, NI, noise_ref[...])     # [2*T*B, E]
    inst = obj_e + noi_e                                                # fused noise add
    inst1 = inst[:TB]                                                   # [T*B, E]
    inst2 = inst[TB:]                                                   # [T*B, E]

    # ---------------- atomic_action2emb: two (Linear -> Tanh) blocks ----------------
    # concat([act_e, inst1, inst2]) @ W1 == act_e@W1a + inst1@W1b + inst2@W1c
    pre1 = (jnp.dot(act_e.astype(bf16), w1a_ref[...], preferred_element_type=f32)
            + jnp.dot(inst1.astype(bf16), w1b_ref[...], preferred_element_type=f32)
            + jnp.dot(inst2.astype(bf16), w1c_ref[...], preferred_element_type=f32)
            + b1_ref[...])
    mlp_h = jnp.tanh(pre1)                                              # [T*B, H]
    emb = jnp.tanh(jnp.dot(mlp_h.astype(bf16), w2_ref[...],
                           preferred_element_type=f32) + b2_ref[...])   # [T*B, H]
    emb_out_ref[...] = emb

    # ---------------- GRU layer 0: hoist input projection out of the loop ----------------
    xproj_ref[...] = (jnp.dot(emb.astype(bf16), wih0_ref[...],
                              preferred_element_type=f32) + bih0_ref[...])   # [T*B, 3H]

    wl1 = wl1_ref[...]                                                  # [H, 6H] = [wih1 | whh0]
    whh1 = whh1_ref[...]                                                # [H, 3H]
    bhh0 = bhh0_ref[...]
    bih1 = bih1_ref[...]
    bhh1 = bhh1_ref[...]
    lengths = lengths_ref[...]                                          # [B, 1] int32

    h0 = jnp.zeros((B, H), f32)
    h1 = jnp.zeros((B, H), f32)
    sketch = jnp.zeros((B, H), f32)
    # h == 0 at t == 0, so the recurrent gate terms are just the biases (no matmul).
    gh0 = jnp.broadcast_to(bhh0, (B, H3))
    gh1 = jnp.broadcast_to(bhh1, (B, H3))

    for t in range(T):                                                  # T is small, static unroll
        # ---- layer 0 (input projection precomputed, recurrence precomputed last step) ----
        gi0 = xproj_ref[t * B:(t + 1) * B, :]                           # [B, 3H] (r|z|n)
        r = jax.nn.sigmoid(gi0[:, 0:H] + gh0[:, 0:H])
        z = jax.nn.sigmoid(gi0[:, H:2 * H] + gh0[:, H:2 * H])
        n = jnp.tanh(gi0[:, 2 * H:H3] + r * gh0[:, 2 * H:H3])
        h0 = (1.0 - z) * n + z * h0

        # one fused matmul: layer-1 input proj (this step) + layer-0 recurrence (next step)
        fused = jnp.dot(h0.astype(bf16), wl1, preferred_element_type=f32)   # [B, 6H]
        gi1 = fused[:, 0:H3] + bih1
        gh0 = fused[:, H3:2 * H3] + bhh0

        # ---- layer 1 ----
        r = jax.nn.sigmoid(gi1[:, 0:H] + gh1[:, 0:H])
        z = jax.nn.sigmoid(gi1[:, H:2 * H] + gh1[:, H:2 * H])
        n = jnp.tanh(gi1[:, 2 * H:H3] + r * gh1[:, 2 * H:H3])
        h1 = (1.0 - z) * n + z * h1

        if t + 1 < T:                                                   # layer-1 recurrence, next step
            gh1 = jnp.dot(h1.astype(bf16), whh1, preferred_element_type=f32) + bhh1

        take = (lengths - 2) == t                                       # [B, 1] bool
        sketch = jnp.where(take, h1, sketch)                            # gather at length-2

    sketch_out_ref[...] = sketch


def prepare_params(params, noise):
    """One-time repack of torch-layout params into kernel-ready layout."""
    bf16 = jnp.bfloat16
    f32 = jnp.float32
    E = params['action_emb'].shape[1]

    def stack_w(w):   # [3, H_in, H_out] -> [H_in, 3*H_out] (columns = r | z | n), bf16
        return jnp.concatenate([w[0], w[1], w[2]], axis=1).astype(bf16)

    def stack_b(b):   # [3, 1, H] -> [1, 3H], f32
        return jnp.concatenate([b[0], b[1], b[2]], axis=1).astype(f32)

    wih1s = stack_w(params['wih1'])
    whh0s = stack_w(params['whh0'])

    return {
        'action_emb': params['action_emb'].astype(f32),
        'object_emb': params['object_emb'].astype(f32),
        'noise': noise.astype(f32),
        # W1 split into the three input blocks (avoids an in-kernel lane concat)
        'w1a': params['w1'][0:E].astype(bf16),
        'w1b': params['w1'][E:2 * E].astype(bf16),
        'w1c': params['w1'][2 * E:3 * E].astype(bf16),
        'b1': params['b1'].astype(f32),
        'w2': params['w2'].astype(bf16), 'b2': params['b2'].astype(f32),
        # layer-0 input projection (hoisted inside kernel)
        'wih0s': stack_w(params['wih0']), 'bih0s': stack_b(params['bih0']),
        # fused per-step weight: h0_new @ [wih1 | whh0] -> gi1 (this step) & gh0 (next step)
        'w_l1': jnp.concatenate([wih1s, whh0s], axis=1),
        'bhh0s': stack_b(params['bhh0']),
        'bih1s': stack_b(params['bih1']),
        'whh1s': stack_w(params['whh1']), 'bhh1s': stack_b(params['bhh1']),
    }


@jax.jit
def program_encoder_forward(kparams, lengths, actions, objs1, objs2, idxs1, idxs2):
    """Thin wrapper: pack int32 indices time-major, run the fused Pallas kernel."""
    B, T = actions.shape
    H = kparams['w2'].shape[1]
    NA = kparams['action_emb'].shape[0]
    NO = kparams['object_emb'].shape[0]
    NI = kparams['noise'].shape[0]

    def tm(x):   # [B, T] -> time-major [T*B, 1] int32 (row = t*B + b)
        return x.T.reshape(T * B, 1).astype(jnp.int32)

    act_idx = tm(actions)
    obj_idx = jnp.concatenate([tm(objs1), tm(objs2)], axis=0)            # [2*T*B, 1]
    noi_idx = jnp.concatenate([tm(idxs1), tm(idxs2)], axis=0)            # [2*T*B, 1]

    kernel = functools.partial(_program_encoder_kernel, B, T, H, NA, NO, NI)
    vmem = pl.BlockSpec(memory_space=pltpu.MemorySpace.VMEM)

    emb_flat, sketch = pl.pallas_call(
        kernel,
        out_shape=(jax.ShapeDtypeStruct((T * B, H), jnp.float32),
                   jax.ShapeDtypeStruct((B, H), jnp.float32)),
        in_specs=[vmem] * 20,
        out_specs=(vmem, vmem),
        scratch_shapes=[pltpu.VMEM((T * B, 3 * H), jnp.float32)],
    )(lengths.reshape(B, 1).astype(jnp.int32), act_idx, obj_idx, noi_idx,
      kparams['action_emb'], kparams['object_emb'], kparams['noise'],
      kparams['w1a'], kparams['w1b'], kparams['w1c'], kparams['b1'],
      kparams['w2'], kparams['b2'],
      kparams['wih0s'], kparams['bih0s'],
      kparams['w_l1'], kparams['bhh0s'], kparams['bih1s'],
      kparams['whh1s'], kparams['bhh1s'])

    embeddings = emb_flat.reshape(T, B, H).transpose(1, 0, 2)            # [B, T, H]
    return sketch, embeddings


def reference_forward(params, noise, lengths, actions, objs1, objs2, idxs1, idxs2):
    """Pure-JAX f32 reference mirroring the PyTorch forward (correctness check)."""
    act_e = params['action_emb'][actions]
    inst1 = params['object_emb'][objs1] + noise[idxs1]
    inst2 = params['object_emb'][objs2] + noise[idxs2]
    atomic = jnp.concatenate([act_e, inst1, inst2], axis=-1)            # [B, T, 3E]
    h = jnp.tanh(atomic @ params['w1'] + params['b1'])
    emb = jnp.tanh(h @ params['w2'] + params['b2'])                     # [B, T, H]

    def gru_layer(x_seq, wih, whh, bih, bhh):
        B, H = x_seq.shape[0], whh.shape[-1]

        def step(hprev, x_t):
            r = jax.nn.sigmoid(x_t @ wih[0] + bih[0] + hprev @ whh[0] + bhh[0])
            z = jax.nn.sigmoid(x_t @ wih[1] + bih[1] + hprev @ whh[1] + bhh[1])
            n = jnp.tanh(x_t @ wih[2] + bih[2] + r * (hprev @ whh[2] + bhh[2]))
            hnew = (1.0 - z) * n + z * hprev
            return hnew, hnew

        _, ys = jax.lax.scan(step, jnp.zeros((B, H), jnp.float32),
                             jnp.swapaxes(x_seq, 0, 1))
        return jnp.swapaxes(ys, 0, 1)

    out0 = gru_layer(emb, params['wih0'], params['whh0'], params['bih0'], params['bhh0'])
    out1 = gru_layer(out0, params['wih1'], params['whh1'], params['bih1'], params['bhh1'])
    B = actions.shape[0]
    sketch = out1[jnp.arange(B), lengths - 2]
    return sketch, emb


if __name__ == "__main__":
    B, T = 2, 8                 # batch, max program length
    E, H = 32, 32               # embedding_dim, hidden
    num_actions, num_objects, num_indexes = 10, 12, 6

    key = jax.random.PRNGKey(0)
    keys = jax.random.split(key, 24)

    def init(k, shape, s=0.1):
        return (s * jax.random.normal(k, shape)).astype(jnp.float32)

    params = {
        'action_emb': init(keys[0], (num_actions, E), 1.0),
        'object_emb': init(keys[1], (num_objects, E), 1.0),
        # atomic_action2emb: fc_block(3E -> H, Tanh), fc_block(H -> H, Tanh)
        'w1': init(keys[2], (3 * E, H)), 'b1': init(keys[3], (1, H)),
        'w2': init(keys[4], (H, H)),     'b2': init(keys[5], (1, H)),
        # 2-layer GRU(H, H): gate-stacked weights [3(r,z,n), in, out] & biases [3, 1, H]
        'wih0': init(keys[6], (3, H, H)),  'whh0': init(keys[7], (3, H, H)),
        'bih0': init(keys[8], (3, 1, H)),  'bhh0': init(keys[9], (3, 1, H)),
        'wih1': init(keys[10], (3, H, H)), 'whh1': init(keys[11], (3, H, H)),
        'bih1': init(keys[12], (3, 1, H)), 'bhh1': init(keys[13], (3, 1, H)),
    }
    # noise_vec ~ Normal(0, 1) with the index_embedding table shape (deterministic draw)
    noise = jax.random.normal(keys[14], (num_indexes, E), jnp.float32)

    actions = jax.random.randint(keys[15], (B, T), 0, num_actions)
    objs1 = jax.random.randint(keys[16], (B, T), 0, num_objects)
    objs2 = jax.random.randint(keys[17], (B, T), 0, num_objects)
    idxs1 = jax.random.randint(keys[18], (B, T), 0, num_indexes)
    idxs2 = jax.random.randint(keys[19], (B, T), 0, num_indexes)
    lengths = jnp.array([T, T - 2], dtype=jnp.int32)                    # batch_length

    kparams = prepare_params(params, noise)                             # one-time repack

    sketch, embeddings = program_encoder_forward(
        kparams, lengths, actions, objs1, objs2, idxs1, idxs2)
    jax.block_until_ready((sketch, embeddings))

    ref_sketch, ref_emb = reference_forward(
        params, noise, lengths, actions, objs1, objs2, idxs1, idxs2)
    # bf16 matmul operands (f32 accumulate) vs pure-f32 reference -> loose tolerance.
    np.testing.assert_allclose(np.asarray(sketch), np.asarray(ref_sketch),
                               atol=2e-2, rtol=2e-2)
    np.testing.assert_allclose(np.asarray(embeddings), np.asarray(ref_emb),
                               atol=2e-2, rtol=2e-2)
    print("KERNEL_OK")
</pallas_src>

<mosaic_0001>
module attributes {stable_mosaic.version = 11 : i64} {
  func.func @_program_encoder_kernel(%arg0: memref<2x1xi32, #tpu.memory_space<vmem>>, %arg1: memref<16x1xi32, #tpu.memory_space<vmem>>, %arg2: memref<32x1xi32, #tpu.memory_space<vmem>>, %arg3: memref<32x1xi32, #tpu.memory_space<vmem>>, %arg4: memref<10x32xf32, #tpu.memory_space<vmem>>, %arg5: memref<12x32xf32, #tpu.memory_space<vmem>>, %arg6: memref<6x32xf32, #tpu.memory_space<vmem>>, %arg7: memref<32x32xbf16, #tpu.memory_space<vmem>>, %arg8: memref<32x32xbf16, #tpu.memory_space<vmem>>, %arg9: memref<32x32xbf16, #tpu.memory_space<vmem>>, %arg10: memref<1x32xf32, #tpu.memory_space<vmem>>, %arg11: memref<32x32xbf16, #tpu.memory_space<vmem>>, %arg12: memref<1x32xf32, #tpu.memory_space<vmem>>, %arg13: memref<32x96xbf16, #tpu.memory_space<vmem>>, %arg14: memref<1x96xf32, #tpu.memory_space<vmem>>, %arg15: memref<32x192xbf16, #tpu.memory_space<vmem>>, %arg16: memref<1x96xf32, #tpu.memory_space<vmem>>, %arg17: memref<1x96xf32, #tpu.memory_space<vmem>>, %arg18: memref<32x96xbf16, #tpu.memory_space<vmem>>, %arg19: memref<1x96xf32, #tpu.memory_space<vmem>>, %arg20: memref<16x32xf32, #tpu.memory_space<vmem>>, %arg21: memref<2x32xf32, #tpu.memory_space<vmem>>, %arg22: memref<16x96xf32, #tpu.memory_space<vmem>>) attributes {dimension_semantics = [], scalar_prefetch = 0 : i64, scratch_operands = 1 : i64, tpu.core_type = #tpu.core_type<tc>} {
    %c0 = arith.constant 0 : index
    %c0_0 = arith.constant 0 : index
    %0 = vector.load %arg1[%c0, %c0_0] : memref<16x1xi32, #tpu.memory_space<vmem>>, vector<16x1xi32>
    %c0_1 = arith.constant 0 : index
    %c0_2 = arith.constant 0 : index
    %1 = vector.load %arg4[%c0_1, %c0_2] : memref<10x32xf32, #tpu.memory_space<vmem>>, vector<10x32xf32>
    %2 = tpu.iota {dimensions = array<i32: 1>} : vector<16x10xi32>
    %3 = vector.broadcast %0 : vector<16x1xi32> to vector<16x10xi32>
    %4 = arith.cmpi eq, %3, %2 : vector<16x10xi32>
    %5 = arith.extui %4 : vector<16x10xi1> to vector<16x10xi32>
    %6 = arith.sitofp %5 : vector<16x10xi32> to vector<16x10xf32>
    %cst = arith.constant dense<0.000000e+00> : vector<16x32xf32>
    %7 = tpu.matmul %6, %1, %cst {dimension_numbers = #tpu.dot_dimension_numbers<[1], [0], [0], [1], [0, 0, 1, 1], [], []>} : vector<16x10xf32>, vector<10x32xf32>, vector<16x32xf32> -> vector<16x32xf32>
    %c0_3 = arith.constant 0 : index
    %c0_4 = arith.constant 0 : index
    %8 = vector.load %arg2[%c0_3, %c0_4] : memref<32x1xi32, #tpu.memory_space<vmem>>, vector<32x1xi32>
    %c0_5 = arith.constant 0 : index
    %c0_6 = arith.constant 0 : index
    %9 = vector.load %arg5[%c0_5, %c0_6] : memref<12x32xf32, #tpu.memory_space<vmem>>, vector<12x32xf32>
    %10 = tpu.iota {dimensions = array<i32: 1>} : vector<32x12xi32>
    %11 = vector.broadcast %8 : vector<32x1xi32> to vector<32x12xi32>
    %12 = arith.cmpi eq, %11, %10 : vector<32x12xi32>
    %13 = arith.extui %12 : vector<32x12xi1> to vector<32x12xi32>
    %14 = arith.sitofp %13 : vector<32x12xi32> to vector<32x12xf32>
    %cst_7 = arith.constant dense<0.000000e+00> : vector<32x32xf32>
    %15 = tpu.matmul %14, %9, %cst_7 {dimension_numbers = #tpu.dot_dimension_numbers<[1], [0], [0], [1], [0, 0, 1, 1], [], []>} : vector<32x12xf32>, vector<12x32xf32>, vector<32x32xf32> -> vector<32x32xf32>
    %c0_8 = arith.constant 0 : index
    %c0_9 = arith.constant 0 : index
    %16 = vector.load %arg3[%c0_8, %c0_9] : memref<32x1xi32, #tpu.memory_space<vmem>>, vector<32x1xi32>
    %c0_10 = arith.constant 0 : index
    %c0_11 = arith.constant 0 : index
    %17 = vector.load %arg6[%c0_10, %c0_11] : memref<6x32xf32, #tpu.memory_space<vmem>>, vector<6x32xf32>
    %18 = tpu.iota {dimensions = array<i32: 1>} : vector<32x6xi32>
    %19 = vector.broadcast %16 : vector<32x1xi32> to vector<32x6xi32>
    %20 = arith.cmpi eq, %19, %18 : vector<32x6xi32>
    %21 = arith.extui %20 : vector<32x6xi1> to vector<32x6xi32>
    %22 = arith.sitofp %21 : vector<32x6xi32> to vector<32x6xf32>
    %cst_12 = arith.constant dense<0.000000e+00> : vector<32x32xf32>
    %23 = tpu.matmul %22, %17, %cst_12 {dimension_numbers = #tpu.dot_dimension_numbers<[1], [0], [0], [1], [0, 0, 1, 1], [], []>} : vector<32x6xf32>, vector<6x32xf32>, vector<32x32xf32> -> vector<32x32xf32>
    %24 = arith.addf %15, %23 : vector<32x32xf32>
    %25 = vector.extract_strided_slice %24 {offsets = [0, 0], sizes = [16, 32], strides = [1, 1]} : vector<32x32xf32> to vector<16x32xf32>
    %26 = vector.extract_strided_slice %24 {offsets = [16, 0], sizes = [16, 32], strides = [1, 1]} : vector<32x32xf32> to vector<16x32xf32>
    %27 = arith.truncf %7 : vector<16x32xf32> to vector<16x32xbf16>
    %c0_13 = arith.constant 0 : index
    %c0_14 = arith.constant 0 : index
    %28 = vector.load %arg7[%c0_13, %c0_14] : memref<32x32xbf16, #tpu.memory_space<vmem>>, vector<32x32xbf16>
    %cst_15 = arith.constant dense<0.000000e+00> : vector<16x32xf32>
    %29 = tpu.matmul %27, %28, %cst_15 {dimension_numbers = #tpu.dot_dimension_numbers<[1], [0], [0], [1], [0, 0, 1, 1], [], []>} : vector<16x32xbf16>, vector<32x32xbf16>, vector<16x32xf32> -> vector<16x32xf32>
    %30 = arith.truncf %25 : vector<16x32xf32> to vector<16x32xbf16>
    %c0_16 = arith.constant 0 : index
    %c0_17 = arith.constant 0 : index
    %31 = vector.load %arg8[%c0_16, %c0_17] : memref<32x32xbf16, #tpu.memory_space<vmem>>, vector<32x32xbf16>
    %cst_18 = arith.constant dense<0.000000e+00> : vector<16x32xf32>
    %32 = tpu.matmul %30, %31, %cst_18 {dimension_numbers = #tpu.dot_dimension_numbers<[1], [0], [0], [1], [0, 0, 1, 1], [], []>} : vector<16x32xbf16>, vector<32x32xbf16>, vector<16x32xf32> -> vector<16x32xf32>
    %33 = arith.addf %29, %32 : vector<16x32xf32>
    %34 = arith.truncf %26 : vector<16x32xf32> to vector<16x32xbf16>
    %c0_19 = arith.constant 0 : index
    %c0_20 = arith.constant 0 : index
    %35 = vector.load %arg9[%c0_19, %c0_20] : memref<32x32xbf16, #tpu.memory_space<vmem>>, vector<32x32xbf16>
    %cst_21 = arith.constant dense<0.000000e+00> : vector<16x32xf32>
    %36 = tpu.matmul %34, %35, %cst_21 {dimension_numbers = #tpu.dot_dimension_numbers<[1], [0], [0], [1], [0, 0, 1, 1], [], []>} : vector<16x32xbf16>, vector<32x32xbf16>, vector<16x32xf32> -> vector<16x32xf32>
    %37 = arith.addf %33, %36 : vector<16x32xf32>
    %c0_22 = arith.constant 0 : index
    %c0_23 = arith.constant 0 : index
    %38 = vector.load %arg10[%c0_22, %c0_23] : memref<1x32xf32, #tpu.memory_space<vmem>>, vector<1x32xf32>
    %39 = vector.broadcast %38 : vector<1x32xf32> to vector<16x32xf32>
    %40 = arith.addf %37, %39 : vector<16x32xf32>
    %41 = math.tanh %40 : vector<16x32xf32>
    %42 = arith.truncf %41 : vector<16x32xf32> to vector<16x32xbf16>
    %c0_24 = arith.constant 0 : index
    %c0_25 = arith.constant 0 : index
    %43 = vector.load %arg11[%c0_24, %c0_25] : memref<32x32xbf16, #tpu.memory_space<vmem>>, vector<32x32xbf16>
    %cst_26 = arith.constant dense<0.000000e+00> : vector<16x32xf32>
    %44 = tpu.matmul %42, %43, %cst_26 {dimension_numbers = #tpu.dot_dimension_numbers<[1], [0], [0], [1], [0, 0, 1, 1], [], []>} : vector<16x32xbf16>, vector<32x32xbf16>, vector<16x32xf32> -> vector<16x32xf32>
    %c0_27 = arith.constant 0 : index
    %c0_28 = arith.constant 0 : index
    %45 = vector.load %arg12[%c0_27, %c0_28] : memref<1x32xf32, #tpu.memory_space<vmem>>, vector<1x32xf32>
    %46 = vector.broadcast %45 : vector<1x32xf32> to vector<16x32xf32>
    %47 = arith.addf %44, %46 : vector<16x32xf32>
    %48 = math.tanh %47 : vector<16x32xf32>
    %c0_29 = arith.constant 0 : index
    %c0_30 = arith.constant 0 : index
    %49 = vector.load %arg20[%c0_29, %c0_30] : memref<16x32xf32, #tpu.memory_space<vmem>>, vector<16x32xf32>
    tpu.vector_store %arg20[%c0_29, %c0_30], %48 {strides = array<i32>} : memref<16x32xf32, #tpu.memory_space<vmem>>, vector<16x32xf32>,
    %50 = arith.truncf %48 : vector<16x32xf32> to vector<16x32xbf16>
    %c0_31 = arith.constant 0 : index
    %c0_32 = arith.constant 0 : index
    %51 = vector.load %arg13[%c0_31, %c0_32] : memref<32x96xbf16, #tpu.memory_space<vmem>>, vector<32x96xbf16>
    %cst_33 = arith.constant dense<0.000000e+00> : vector<16x96xf32>
    %52 = tpu.matmul %50, %51, %cst_33 {dimension_numbers = #tpu.dot_dimension_numbers<[1], [0], [0], [1], [0, 0, 1, 1], [], []>} : vector<16x32xbf16>, vector<32x96xbf16>, vector<16x96xf32> -> vector<16x96xf32>
    %c0_34 = arith.constant 0 : index
    %c0_35 = arith.constant 0 : index
    %53 = vector.load %arg14[%c0_34, %c0_35] : memref<1x96xf32, #tpu.memory_space<vmem>>, vector<1x96xf32>
    %54 = vector.broadcast %53 : vector<1x96xf32> to vector<16x96xf32>
    %55 = arith.addf %52, %54 : vector<16x96xf32>
    %c0_36 = arith.constant 0 : index
    %c0_37 = arith.constant 0 : index
    %56 = vector.load %arg22[%c0_36, %c0_37] : memref<16x96xf32, #tpu.memory_space<vmem>>, vector<16x96xf32>
    tpu.vector_store %arg22[%c0_36, %c0_37], %55 {strides = array<i32>} : memref<16x96xf32, #tpu.memory_space<vmem>>, vector<16x96xf32>,
    %c0_38 = arith.constant 0 : index
    %c0_39 = arith.constant 0 : index
    %57 = vector.load %arg15[%c0_38, %c0_39] : memref<32x192xbf16, #tpu.memory_space<vmem>>, vector<32x192xbf16>
    %c0_40 = arith.constant 0 : index
    %c0_41 = arith.constant 0 : index
    %58 = vector.load %arg18[%c0_40, %c0_41] : memref<32x96xbf16, #tpu.memory_space<vmem>>, vector<32x96xbf16>
    %c0_42 = arith.constant 0 : index
    %c0_43 = arith.constant 0 : index
    %59 = vector.load %arg16[%c0_42, %c0_43] : memref<1x96xf32, #tpu.memory_space<vmem>>, vector<1x96xf32>
    %c0_44 = arith.constant 0 : index
    %c0_45 = arith.constant 0 : index
    %60 = vector.load %arg17[%c0_44, %c0_45] : memref<1x96xf32, #tpu.memory_space<vmem>>, vector<1x96xf32>
    %c0_46 = arith.constant 0 : index
    %c0_47 = arith.constant 0 : index
    %61 = vector.load %arg19[%c0_46, %c0_47] : memref<1x96xf32, #tpu.memory_space<vmem>>, vector<1x96xf32>
    %c0_48 = arith.constant 0 : index
    %c0_49 = arith.constant 0 : index
    %62 = vector.load %arg0[%c0_48, %c0_49] : memref<2x1xi32, #tpu.memory_space<vmem>>, vector<2x1xi32>
    %cst_50 = arith.constant 0.000000e+00 : f32
    %63 = vector.broadcast %cst_50 : f32 to vector<2x32xf32>
    %cst_51 = arith.constant 0.000000e+00 : f32
    %64 = vector.broadcast %cst_51 : f32 to vector<2x32xf32>
    %cst_52 = arith.constant 0.000000e+00 : f32
    %65 = vector.broadcast %cst_52 : f32 to vector<2x32xf32>
    %66 = vector.shape_cast %59 : vector<1x96xf32> to vector<1x96xf32>
    %67 = vector.broadcast %66 : vector<1x96xf32> to vector<2x96xf32>
    %68 = vector.shape_cast %61 : vector<1x96xf32> to vector<1x96xf32>
    %69 = vector.broadcast %68 : vector<1x96xf32> to vector<2x96xf32>
    %c0_53 = arith.constant 0 : index
    %c0_54 = arith.constant 0 : index
    %70 = vector.load %arg22[%c0_53, %c0_54] : memref<16x96xf32, #tpu.memory_space<vmem>>, vector<2x96xf32>
    %71 = vector.extract_strided_slice %70 {offsets = [0, 0], sizes = [2, 32], strides = [1, 1]} : vector<2x96xf32> to vector<2x32xf32>
    %72 = vector.extract_strided_slice %67 {offsets = [0, 0], sizes = [2, 32], strides = [1, 1]} : vector<2x96xf32> to vector<2x32xf32>
    %73 = arith.addf %71, %72 : vector<2x32xf32>
    %74 = arith.negf %73 : vector<2x32xf32>
    %75 = math.exp %74 : vector<2x32xf32>
    %cst_55 = arith.constant 1.000000e+00 : f32
    %76 = vector.broadcast %cst_55 : f32 to vector<2x32xf32>
    %77 = arith.addf %76, %75 : vector<2x32xf32>
    %78 = arith.divf %76, %77 : vector<2x32xf32>
    %79 = vector.extract_strided_slice %70 {offsets = [0, 32], sizes = [2, 32], strides = [1, 1]} : vector<2x96xf32> to vector<2x32xf32>
    %80 = vector.extract_strided_slice %67 {offsets = [0, 32], sizes = [2, 32], strides = [1, 1]} : vector<2x96xf32> to vector<2x32xf32>
    %81 = arith.addf %79, %80 : vector<2x32xf32>
    %82 = arith.negf %81 : vector<2x32xf32>
    %83 = math.exp %82 : vector<2x32xf32>
    %cst_56 = arith.constant 1.000000e+00 : f32
    %84 = vector.broadcast %cst_56 : f32 to vector<2x32xf32>
    %85 = arith.addf %84, %83 : vector<2x32xf32>
    %86 = arith.divf %84, %85 : vector<2x32xf32>
    %87 = vector.extract_strided_slice %70 {offsets = [0, 64], sizes = [2, 32], strides = [1, 1]} : vector<2x96xf32> to vector<2x32xf32>
    %88 = vector.extract_strided_slice %67 {offsets = [0, 64], sizes = [2, 32], strides = [1, 1]} : vector<2x96xf32> to vector<2x32xf32>
    %89 = arith.mulf %78, %88 : vector<2x32xf32>
    %90 = arith.addf %87, %89 : vector<2x32xf32>
    %91 = math.tanh %90 : vector<2x32xf32>
    %cst_57 = arith.constant 1.000000e+00 : f32
    %92 = vector.broadcast %cst_57 : f32 to vector<2x32xf32>
    %93 = arith.subf %92, %86 : vector<2x32xf32>
    %94 = arith.mulf %93, %91 : vector<2x32xf32>
    %95 = arith.mulf %86, %63 : vector<2x32xf32>
    %96 = arith.addf %94, %95 : vector<2x32xf32>
    %97 = arith.truncf %96 : vector<2x32xf32> to vector<2x32xbf16>
    %cst_58 = arith.constant dense<0.000000e+00> : vector<2x192xf32>
    %98 = tpu.matmul %97, %57, %cst_58 {dimension_numbers = #tpu.dot_dimension_numbers<[1], [0], [0], [1], [0, 0, 1, 1], [], []>} : vector<2x32xbf16>, vector<32x192xbf16>, vector<2x192xf32> -> vector<2x192xf32>
    %99 = vector.extract_strided_slice %98 {offsets = [0, 0], sizes = [2, 96], strides = [1, 1]} : vector<2x192xf32> to vector<2x96xf32>
    %100 = vector.broadcast %60 : vector<1x96xf32> to vector<2x96xf32>
    %101 = arith.addf %99, %100 : vector<2x96xf32>
    %102 = vector.extract_strided_slice %98 {offsets = [0, 96], sizes = [2, 96], strides = [1, 1]} : vector<2x192xf32> to vector<2x96xf32>
    %103 = vector.broadcast %59 : vector<1x96xf32> to vector<2x96xf32>
    %104 = arith.addf %102, %103 : vector<2x96xf32>
    %105 = vector.extract_strided_slice %101 {offsets = [0, 0], sizes = [2, 32], strides = [1, 1]} : vector<2x96xf32> to vector<2x32xf32>
    %106 = vector.extract_strided_slice %69 {offsets = [0, 0], sizes = [2, 32], strides = [1, 1]} : vector<2x96xf32> to vector<2x32xf32>
    %107 = arith.addf %105, %106 : vector<2x32xf32>
    %108 = arith.negf %107 : vector<2x32xf32>
    %109 = math.exp %108 : vector<2x32xf32>
    %cst_59 = arith.constant 1.000000e+00 : f32
    %110 = vector.broadcast %cst_59 : f32 to vector<2x32xf32>
    %111 = arith.addf %110, %109 : vector<2x32xf32>
    %112 = arith.divf %110, %111 : vector<2x32xf32>
    %113 = vector.extract_strided_slice %101 {offsets = [0, 32], sizes = [2, 32], strides = [1, 1]} : vector<2x96xf32> to vector<2x32xf32>
    %114 = vector.extract_strided_slice %69 {offsets = [0, 32], sizes = [2, 32], strides = [1, 1]} : vector<2x96xf32> to vector<2x32xf32>
    %115 = arith.addf %113, %114 : vector<2x32xf32>
    %116 = arith.negf %115 : vector<2x32xf32>
    %117 = math.exp %116 : vector<2x32xf32>
    %cst_60 = arith.constant 1.000000e+00 : f32
    %118 = vector.broadcast %cst_60 : f32 to vector<2x32xf32>
    %119 = arith.addf %118, %117 : vector<2x32xf32>
    %120 = arith.divf %118, %119 : vector<2x32xf32>
    %121 = vector.extract_strided_slice %101 {offsets = [0, 64], sizes = [2, 32], strides = [1, 1]} : vector<2x96xf32> to vector<2x32xf32>
    %122 = vector.extract_strided_slice %69 {offsets = [0, 64], sizes = [2, 32], strides = [1, 1]} : vector<2x96xf32> to vector<2x32xf32>
    %123 = arith.mulf %112, %122 : vector<2x32xf32>
    %124 = arith.addf %121, %123 : vector<2x32xf32>
    %125 = math.tanh %124 : vector<2x32xf32>
    %cst_61 = arith.constant 1.000000e+00 : f32
    %126 = vector.broadcast %cst_61 : f32 to vector<2x32xf32>
    %127 = arith.subf %126, %120 : vector<2x32xf32>
    %128 = arith.mulf %127, %125 : vector<2x32xf32>
    %129 = arith.mulf %120, %64 : vector<2x32xf32>
    %130 = arith.addf %128, %129 : vector<2x32xf32>
    %131 = arith.truncf %130 : vector<2x32xf32> to vector<2x32xbf16>
    %cst_62 = arith.constant dense<0.000000e+00> : vector<2x96xf32>
    %132 = tpu.matmul %131, %58, %cst_62 {dimension_numbers = #tpu.dot_dimension_numbers<[1], [0], [0], [1], [0, 0, 1, 1], [], []>} : vector<2x32xbf16>, vector<32x96xbf16>, vector<2x96xf32> -> vector<2x96xf32>
    %133 = vector.broadcast %61 : vector<1x96xf32> to vector<2x96xf32>
    %134 = arith.addf %132, %133 : vector<2x96xf32>
    %c2_i32 = arith.constant 2 : i32
    %135 = vector.broadcast %c2_i32 : i32 to vector<2x1xi32>
    %136 = arith.subi %62, %135 : vector<2x1xi32>
    %c0_i32 = arith.constant 0 : i32
    %137 = vector.broadcast %c0_i32 : i32 to vector<2x1xi32>
    %138 = arith.cmpi eq, %136, %137 : vector<2x1xi32>
    %139 = vector.shape_cast %138 : vector<2x1xi1> to vector<2x1xi1>
    %140 = vector.broadcast %139 : vector<2x1xi1> to vector<2x32xi1>
    %141 = arith.select %140, %130, %65 : vector<2x32xi1>, vector<2x32xf32>
    %c2 = arith.constant 2 : index
    %c0_63 = arith.constant 0 : index
    %142 = vector.load %arg22[%c2, %c0_63] : memref<16x96xf32, #tpu.memory_space<vmem>>, vector<2x96xf32>
    %143 = vector.extract_strided_slice %142 {offsets = [0, 0], sizes = [2, 32], strides = [1, 1]} : vector<2x96xf32> to vector<2x32xf32>
    %144 = vector.extract_strided_slice %104 {offsets = [0, 0], sizes = [2, 32], strides = [1, 1]} : vector<2x96xf32> to vector<2x32xf32>
    %145 = arith.addf %143, %144 : vector<2x32xf32>
    %146 = arith.negf %145 : vector<2x32xf32>
    %147 = math.exp %146 : vector<2x32xf32>
    %cst_64 = arith.constant 1.000000e+00 : f32
    %148 = vector.broadcast %cst_64 : f32 to vector<2x32xf32>
    %149 = arith.addf %148, %147 : vector<2x32xf32>
    %150 = arith.divf %148, %149 : vector<2x32xf32>
    %151 = vector.extract_strided_slice %142 {offsets = [0, 32], sizes = [2, 32], strides = [1, 1]} : vector<2x96xf32> to vector<2x32xf32>
    %152 = vector.extract_strided_slice %104 {offsets = [0, 32], sizes = [2, 32], strides = [1, 1]} : vector<2x96xf32> to vector<2x32xf32>
    %153 = arith.addf %151, %152 : vector<2x32xf32>
    %154 = arith.negf %153 : vector<2x32xf32>
    %155 = math.exp %154 : vector<2x32xf32>
    %cst_65 = arith.constant 1.000000e+00 : f32
    %156 = vector.broadcast %cst_65 : f32 to vector<2x32xf32>
    %157 = arith.addf %156, %155 : vector<2x32xf32>
    %158 = arith.divf %156, %157 : vector<2x32xf32>
    %159 = vector.extract_strided_slice %142 {offsets = [0, 64], sizes = [2, 32], strides = [1, 1]} : vector<2x96xf32> to vector<2x32xf32>
    %160 = vector.extract_strided_slice %104 {offsets = [0, 64], sizes = [2, 32], strides = [1, 1]} : vector<2x96xf32> to vector<2x32xf32>
    %161 = arith.mulf %150, %160 : vector<2x32xf32>
    %162 = arith.addf %159, %161 : vector<2x32xf32>
    %163 = math.tanh %162 : vector<2x32xf32>
    %cst_66 = arith.constant 1.000000e+00 : f32
    %164 = vector.broadcast %cst_66 : f32 to vector<2x32xf32>
    %165 = arith.subf %164, %158 : vector<2x32xf32>
    %166 = arith.mulf %165, %163 : vector<2x32xf32>
    %167 = arith.mulf %158, %96 : vector<2x32xf32>
    %168 = arith.addf %166, %167 : vector<2x32xf32>
    %169 = arith.truncf %168 : vector<2x32xf32> to vector<2x32xbf16>
    %cst_67 = arith.constant dense<0.000000e+00> : vector<2x192xf32>
    %170 = tpu.matmul %169, %57, %cst_67 {dimension_numbers = #tpu.dot_dimension_numbers<[1], [0], [0], [1], [0, 0, 1, 1], [], []>} : vector<2x32xbf16>, vector<32x192xbf16>, vector<2x192xf32> -> vector<2x192xf32>
    %171 = vector.extract_strided_slice %170 {offsets = [0, 0], sizes = [2, 96], strides = [1, 1]} : vector<2x192xf32> to vector<2x96xf32>
    %172 = vector.broadcast %60 : vector<1x96xf32> to vector<2x96xf32>
    %173 = arith.addf %171, %172 : vector<2x96xf32>
    %174 = vector.extract_strided_slice %170 {offsets = [0, 96], sizes = [2, 96], strides = [1, 1]} : vector<2x192xf32> to vector<2x96xf32>
    %175 = vector.broadcast %59 : vector<1x96xf32> to vector<2x96xf32>
    %176 = arith.addf %174, %175 : vector<2x96xf32>
    %177 = vector.extract_strided_slice %173 {offsets = [0, 0], sizes = [2, 32], strides = [1, 1]} : vector<2x96xf32> to vector<2x32xf32>
    %178 = vector.extract_strided_slice %134 {offsets = [0, 0], sizes = [2, 32], strides = [1, 1]} : vector<2x96xf32> to vector<2x32xf32>
    %179 = arith.addf %177, %178 : vector<2x32xf32>
    %180 = arith.negf %179 : vector<2x32xf32>
    %181 = math.exp %180 : vector<2x32xf32>
    %cst_68 = arith.constant 1.000000e+00 : f32
    %182 = vector.broadcast %cst_68 : f32 to vector<2x32xf32>
    %183 = arith.addf %182, %181 : vector<2x32xf32>
    %184 = arith.divf %182, %183 : vector<2x32xf32>
    %185 = vector.extract_strided_slice %173 {offsets = [0, 32], sizes = [2, 32], strides = [1, 1]} : vector<2x96xf32> to vector<2x32xf32>
    %186 = vector.extract_strided_slice %134 {offsets = [0, 32], sizes = [2, 32], strides = [1, 1]} : vector<2x96xf32> to vector<2x32xf32>
    %187 = arith.addf %185, %186 : vector<2x32xf32>
    %188 = arith.negf %187 : vector<2x32xf32>
    %189 = math.exp %188 : vector<2x32xf32>
    %cst_69 = arith.constant 1.000000e+00 : f32
    %190 = vector.broadcast %cst_69 : f32 to vector<2x32xf32>
    %191 = arith.addf %190, %189 : vector<2x32xf32>
    %192 = arith.divf %190, %191 : vector<2x32xf32>
    %193 = vector.extract_strided_slice %173 {offsets = [0, 64], sizes = [2, 32], strides = [1, 1]} : vector<2x96xf32> to vector<2x32xf32>
    %194 = vector.extract_strided_slice %134 {offsets = [0, 64], sizes = [2, 32], strides = [1, 1]} : vector<2x96xf32> to vector<2x32xf32>
    %195 = arith.mulf %184, %194 : vector<2x32xf32>
    %196 = arith.addf %193, %195 : vector<2x32xf32>
    %197 = math.tanh %196 : vector<2x32xf32>
    %cst_70 = arith.constant 1.000000e+00 : f32
    %198 = vector.broadcast %cst_70 : f32 to vector<2x32xf32>
    %199 = arith.subf %198, %192 : vector<2x32xf32>
    %200 = arith.mulf %199, %197 : vector<2x32xf32>
    %201 = arith.mulf %192, %130 : vector<2x32xf32>
    %202 = arith.addf %200, %201 : vector<2x32xf32>
    %203 = arith.truncf %202 : vector<2x32xf32> to vector<2x32xbf16>
    %cst_71 = arith.constant dense<0.000000e+00> : vector<2x96xf32>
    %204 = tpu.matmul %203, %58, %cst_71 {dimension_numbers = #tpu.dot_dimension_numbers<[1], [0], [0], [1], [0, 0, 1, 1], [], []>} : vector<2x32xbf16>, vector<32x96xbf16>, vector<2x96xf32> -> vector<2x96xf32>
    %205 = vector.broadcast %61 : vector<1x96xf32> to vector<2x96xf32>
    %206 = arith.addf %204, %205 : vector<2x96xf32>
    %c2_i32_72 = arith.constant 2 : i32
    %207 = vector.broadcast %c2_i32_72 : i32 to vector<2x1xi32>
    %208 = arith.subi %62, %207 : vector<2x1xi32>
    %c1_i32 = arith.constant 1 : i32
    %209 = vector.broadcast %c1_i32 : i32 to vector<2x1xi32>
    %210 = arith.cmpi eq, %208, %209 : vector<2x1xi32>
    %211 = vector.shape_cast %210 : vector<2x1xi1> to vector<2x1xi1>
    %212 = vector.broadcast %211 : vector<2x1xi1> to vector<2x32xi1>
    %213 = arith.select %212, %202, %141 : vector<2x32xi1>, vector<2x32xf32>
    %c4 = arith.constant 4 : index
    %c0_73 = arith.constant 0 : index
    %214 = vector.load %arg22[%c4, %c0_73] : memref<16x96xf32, #tpu.memory_space<vmem>>, vector<2x96xf32>
    %215 = vector.extract_strided_slice %214 {offsets = [0, 0], sizes = [2, 32], strides = [1, 1]} : vector<2x96xf32> to vector<2x32xf32>
    %216 = vector.extract_strided_slice %176 {offsets = [0, 0], sizes = [2, 32], strides = [1, 1]} : vector<2x96xf32> to vector<2x32xf32>
    %217 = arith.addf %215, %216 : vector<2x32xf32>
    %218 = arith.negf %217 : vector<2x32xf32>
    %219 = math.exp %218 : vector<2x32xf32>
    %cst_74 = arith.constant 1.000000e+00 : f32
    %220 = vector.broadcast %cst_74 : f32 to vector<2x32xf32>
    %221 = arith.addf %220, %219 : vector<2x32xf32>
    %222 = arith.divf %220, %221 : vector<2x32xf32>
    %223 = vector.extract_strided_slice %214 {offsets = [0, 32], sizes = [2, 32], strides = [1, 1]} : vector<2x96xf32> to vector<2x32xf32>
    %224 = vector.extract_strided_slice %176 {offsets = [0, 32], sizes = [2, 32], strides = [1, 1]} : vector<2x96xf32> to vector<2x32xf32>
    %225 = arith.addf %223, %224 : vector<2x32xf32>
    %226 = arith.negf %225 : vector<2x32xf32>
    %227 = math.exp %226 : vector<2x32xf32>
    %cst_75 = arith.constant 1.000000e+00 : f32
    %228 = vector.broadcast %cst_75 : f32 to vector<2x32xf32>
    %229 = arith.addf %228, %227 : vector<2x32xf32>
    %230 = arith.divf %228, %229 : vector<2x32xf32>
    %231 = vector.extract_strided_slice %214 {offsets = [0, 64], sizes = [2, 32], strides = [1, 1]} : vector<2x96xf32> to vector<2x32xf32>
    %232 = vector.extract_strided_slice %176 {offsets = [0, 64], sizes = [2, 32], strides = [1, 1]} : vector<2x96xf32> to vector<2x32xf32>
    %233 = arith.mulf %222, %232 : vector<2x32xf32>
    %234 = arith.addf %231, %233 : vector<2x32xf32>
    %235 = math.tanh %234 : vector<2x32xf32>
    %cst_76 = arith.constant 1.000000e+00 : f32
    %236 = vector.broadcast %cst_76 : f32 to vector<2x32xf32>
    %237 = arith.subf %236, %230 : vector<2x32xf32>
    %238 = arith.mulf %237, %235 : vector<2x32xf32>
    %239 = arith.mulf %230, %168 : vector<2x32xf32>
    %240 = arith.addf %238, %239 : vector<2x32xf32>
    %241 = arith.truncf %240 : vector<2x32xf32> to vector<2x32xbf16>
    %cst_77 = arith.constant dense<0.000000e+00> : vector<2x192xf32>
    %242 = tpu.matmul %241, %57, %cst_77 {dimension_numbers = #tpu.dot_dimension_numbers<[1], [0], [0], [1], [0, 0, 1, 1], [], []>} : vector<2x32xbf16>, vector<32x192xbf16>, vector<2x192xf32> -> vector<2x192xf32>
    %243 = vector.extract_strided_slice %242 {offsets = [0, 0], sizes = [2, 96], strides = [1, 1]} : vector<2x192xf32> to vector<2x96xf32>
    %244 = vector.broadcast %60 : vector<1x96xf32> to vector<2x96xf32>
    %245 = arith.addf %243, %244 : vector<2x96xf32>
    %246 = vector.extract_strided_slice %242 {offsets = [0, 96], sizes = [2, 96], strides = [1, 1]} : vector<2x192xf32> to vector<2x96xf32>
    %247 = vector.broadcast %59 : vector<1x96xf32> to vector<2x96xf32>
    %248 = arith.addf %246, %247 : vector<2x96xf32>
    %249 = vector.extract_strided_slice %245 {offsets = [0, 0], sizes = [2, 32], strides = [1, 1]} : vector<2x96xf32> to vector<2x32xf32>
    %250 = vector.extract_strided_slice %206 {offsets = [0, 0], sizes = [2, 32], strides = [1, 1]} : vector<2x96xf32> to vector<2x32xf32>
    %251 = arith.addf %249, %250 : vector<2x32xf32>
    %252 = arith.negf %251 : vector<2x32xf32>
    %253 = math.exp %252 : vector<2x32xf32>
    %cst_78 = arith.constant 1.000000e+00 : f32
    %254 = vector.broadcast %cst_78 : f32 to vector<2x32xf32>
    %255 = arith.addf %254, %253 : vector<2x32xf32>
    %256 = arith.divf %254, %255 : vector<2x32xf32>
    %257 = vector.extract_strided_slice %245 {offsets = [0, 32], sizes = [2, 32], strides = [1, 1]} : vector<2x96xf32> to vector<2x32xf32>
    %258 = vector.extract_strided_slice %206 {offsets = [0, 32], sizes = [2, 32], strides = [1, 1]} : vector<2x96xf32> to vector<2x32xf32>
    %259 = arith.addf %257, %258 : vector<2x32xf32>
    %260 = arith.negf %259 : vector<2x32xf32>
    %261 = math.exp %260 : vector<2x32xf32>
    %cst_79 = arith.constant 1.000000e+00 : f32
    %262 = vector.broadcast %cst_79 : f32 to vector<2x32xf32>
    %263 = arith.addf %262, %261 : vector<2x32xf32>
    %264 = arith.divf %262, %263 : vector<2x32xf32>
    %265 = vector.extract_strided_slice %245 {offsets = [0, 64], sizes = [2, 32], strides = [1, 1]} : vector<2x96xf32> to vector<2x32xf32>
    %266 = vector.extract_strided_slice %206 {offsets = [0, 64], sizes = [2, 32], strides = [1, 1]} : vector<2x96xf32> to vector<2x32xf32>
    %267 = arith.mulf %256, %266 : vector<2x32xf32>
    %268 = arith.addf %265, %267 : vector<2x32xf32>
    %269 = math.tanh %268 : vector<2x32xf32>
    %cst_80 = arith.constant 1.000000e+00 : f32
    %270 = vector.broadcast %cst_80 : f32 to vector<2x32xf32>
    %271 = arith.subf %270, %264 : vector<2x32xf32>
    %272 = arith.mulf %271, %269 : vector<2x32xf32>
    %273 = arith.mulf %264, %202 : vector<2x32xf32>
    %274 = arith.addf %272, %273 : vector<2x32xf32>
    %275 = arith.truncf %274 : vector<2x32xf32> to vector<2x32xbf16>
    %cst_81 = arith.constant dense<0.000000e+00> : vector<2x96xf32>
    %276 = tpu.matmul %275, %58, %cst_81 {dimension_numbers = #tpu.dot_dimension_numbers<[1], [0], [0], [1], [0, 0, 1, 1], [], []>} : vector<2x32xbf16>, vector<32x96xbf16>, vector<2x96xf32> -> vector<2x96xf32>
    %277 = vector.broadcast %61 : vector<1x96xf32> to vector<2x96xf32>
    %278 = arith.addf %276, %277 : vector<2x96xf32>
    %c2_i32_82 = arith.constant 2 : i32
    %279 = vector.broadcast %c2_i32_82 : i32 to vector<2x1xi32>
    %280 = arith.subi %62, %279 : vector<2x1xi32>
    %c2_i32_83 = arith.constant 2 : i32
    %281 = vector.broadcast %c2_i32_83 : i32 to vector<2x1xi32>
    %282 = arith.cmpi eq, %280, %281 : vector<2x1xi32>
    %283 = vector.shape_cast %282 : vector<2x1xi1> to vector<2x1xi1>
    %284 = vector.broadcast %283 : vector<2x1xi1> to vector<2x32xi1>
    %285 = arith.select %284, %274, %213 : vector<2x32xi1>, vector<2x32xf32>
    %c6 = arith.constant 6 : index
    %c0_84 = arith.constant 0 : index
    %286 = vector.load %arg22[%c6, %c0_84] : memref<16x96xf32, #tpu.memory_space<vmem>>, vector<2x96xf32>
    %287 = vector.extract_strided_slice %286 {offsets = [0, 0], sizes = [2, 32], strides = [1, 1]} : vector<2x96xf32> to vector<2x32xf32>
    %288 = vector.extract_strided_slice %248 {offsets = [0, 0], sizes = [2, 32], strides = [1, 1]} : vector<2x96xf32> to vector<2x32xf32>
    %289 = arith.addf %287, %288 : vector<2x32xf32>
    %290 = arith.negf %289 : vector<2x32xf32>
    %291 = math.exp %290 : vector<2x32xf32>
    %cst_85 = arith.constant 1.000000e+00 : f32
    %292 = vector.broadcast %cst_85 : f32 to vector<2x32xf32>
    %293 = arith.addf %292, %291 : vector<2x32xf32>
    %294 = arith.divf %292, %293 : vector<2x32xf32>
    %295 = vector.extract_strided_slice %286 {offsets = [0, 32], sizes = [2, 32], strides = [1, 1]} : vector<2x96xf32> to vector<2x32xf32>
    %296 = vector.extract_strided_slice %248 {offsets = [0, 32], sizes = [2, 32], strides = [1, 1]} : vector<2x96xf32> to vector<2x32xf32>
    %297 = arith.addf %295, %296 : vector<2x32xf32>
    %298 = arith.negf %297 : vector<2x32xf32>
    %299 = math.exp %298 : vector<2x32xf32>
    %cst_86 = arith.constant 1.000000e+00 : f32
    %300 = vector.broadcast %cst_86 : f32 to vector<2x32xf32>
    %301 = arith.addf %300, %299 : vector<2x32xf32>
    %302 = arith.divf %300, %301 : vector<2x32xf32>
    %303 = vector.extract_strided_slice %286 {offsets = [0, 64], sizes = [2, 32], strides = [1, 1]} : vector<2x96xf32> to vector<2x32xf32>
    %304 = vector.extract_strided_slice %248 {offsets = [0, 64], sizes = [2, 32], strides = [1, 1]} : vector<2x96xf32> to vector<2x32xf32>
    %305 = arith.mulf %294, %304 : vector<2x32xf32>
    %306 = arith.addf %303, %305 : vector<2x32xf32>
    %307 = math.tanh %306 : vector<2x32xf32>
    %cst_87 = arith.constant 1.000000e+00 : f32
    %308 = vector.broadcast %cst_87 : f32 to vector<2x32xf32>
    %309 = arith.subf %308, %302 : vector<2x32xf32>
    %310 = arith.mulf %309, %307 : vector<2x32xf32>
    %311 = arith.mulf %302, %240 : vector<2x32xf32>
    %312 = arith.addf %310, %311 : vector<2x32xf32>
    %313 = arith.truncf %312 : vector<2x32xf32> to vector<2x32xbf16>
    %cst_88 = arith.constant dense<0.000000e+00> : vector<2x192xf32>
    %314 = tpu.matmul %313, %57, %cst_88 {dimension_numbers = #tpu.dot_dimension_numbers<[1], [0], [0], [1], [0, 0, 1, 1], [], []>} : vector<2x32xbf16>, vector<32x192xbf16>, vector<2x192xf32> -> vector<2x192xf32>
    %315 = vector.extract_strided_slice %314 {offsets = [0, 0], sizes = [2, 96], strides = [1, 1]} : vector<2x192xf32> to vector<2x96xf32>
    %316 = vector.broadcast %60 : vector<1x96xf32> to vector<2x96xf32>
    %317 = arith.addf %315, %316 : vector<2x96xf32>
    %318 = vector.extract_strided_slice %314 {offsets = [0, 96], sizes = [2, 96], strides = [1, 1]} : vector<2x192xf32> to vector<2x96xf32>
    %319 = vector.broadcast %59 : vector<1x96xf32> to vector<2x96xf32>
    %320 = arith.addf %318, %319 : vector<2x96xf32>
    %321 = vector.extract_strided_slice %317 {offsets = [0, 0], sizes = [2, 32], strides = [1, 1]} : vector<2x96xf32> to vector<2x32xf32>
    %322 = vector.extract_strided_slice %278 {offsets = [0, 0], sizes = [2, 32], strides = [1, 1]} : vector<2x96xf32> to vector<2x32xf32>
    %323 = arith.addf %321, %322 : vector<2x32xf32>
    %324 = arith.negf %323 : vector<2x32xf32>
    %325 = math.exp %324 : vector<2x32xf32>
    %cst_89 = arith.constant 1.000000e+00 : f32
    %326 = vector.broadcast %cst_89 : f32 to vector<2x32xf32>
    %327 = arith.addf %326, %325 : vector<2x32xf32>
    %328 = arith.divf %326, %327 : vector<2x32xf32>
    %329 = vector.extract_strided_slice %317 {offsets = [0, 32], sizes = [2, 32], strides = [1, 1]} : vector<2x96xf32> to vector<2x32xf32>
    %330 = vector.extract_strided_slice %278 {offsets = [0, 32], sizes = [2, 32], strides = [1, 1]} : vector<2x96xf32> to vector<2x32xf32>
    %331 = arith.addf %329, %330 : vector<2x32xf32>
    %332 = arith.negf %331 : vector<2x32xf32>
    %333 = math.exp %332 : vector<2x32xf32>
    %cst_90 = arith.constant 1.000000e+00 : f32
    %334 = vector.broadcast %cst_90 : f32 to vector<2x32xf32>
    %335 = arith.addf %334, %333 : vector<2x32xf32>
    %336 = arith.divf %334, %335 : vector<2x32xf32>
    %337 = vector.extract_strided_slice %317 {offsets = [0, 64], sizes = [2, 32], strides = [1, 1]} : vector<2x96xf32> to vector<2x32xf32>
    %338 = vector.extract_strided_slice %278 {offsets = [0, 64], sizes = [2, 32], strides = [1, 1]} : vector<2x96xf32> to vector<2x32xf32>
    %339 = arith.mulf %328, %338 : vector<2x32xf32>
    %340 = arith.addf %337, %339 : vector<2x32xf32>
    %341 = math.tanh %340 : vector<2x32xf32>
    %cst_91 = arith.constant 1.000000e+00 : f32
    %342 = vector.broadcast %cst_91 : f32 to vector<2x32xf32>
    %343 = arith.subf %342, %336 : vector<2x32xf32>
    %344 = arith.mulf %343, %341 : vector<2x32xf32>
    %345 = arith.mulf %336, %274 : vector<2x32xf32>
    %346 = arith.addf %344, %345 : vector<2x32xf32>
    %347 = arith.truncf %346 : vector<2x32xf32> to vector<2x32xbf16>
    %cst_92 = arith.constant dense<0.000000e+00> : vector<2x96xf32>
    %348 = tpu.matmul %347, %58, %cst_92 {dimension_numbers = #tpu.dot_dimension_numbers<[1], [0], [0], [1], [0, 0, 1, 1], [], []>} : vector<2x32xbf16>, vector<32x96xbf16>, vector<2x96xf32> -> vector<2x96xf32>
    %349 = vector.broadcast %61 : vector<1x96xf32> to vector<2x96xf32>
    %350 = arith.addf %348, %349 : vector<2x96xf32>
    %c2_i32_93 = arith.constant 2 : i32
    %351 = vector.broadcast %c2_i32_93 : i32 to vector<2x1xi32>
    %352 = arith.subi %62, %351 : vector<2x1xi32>
    %c3_i32 = arith.constant 3 : i32
    %353 = vector.broadcast %c3_i32 : i32 to vector<2x1xi32>
    %354 = arith.cmpi eq, %352, %353 : vector<2x1xi32>
    %355 = vector.shape_cast %354 : vector<2x1xi1> to vector<2x1xi1>
    %356 = vector.broadcast %355 : vector<2x1xi1> to vector<2x32xi1>
    %357 = arith.select %356, %346, %285 : vector<2x32xi1>, vector<2x32xf32>
    %c8 = arith.constant 8 : index
    %c0_94 = arith.constant 0 : index
    %358 = vector.load %arg22[%c8, %c0_94] : memref<16x96xf32, #tpu.memory_space<vmem>>, vector<2x96xf32>
    %359 = vector.extract_strided_slice %358 {offsets = [0, 0], sizes = [2, 32], strides = [1, 1]} : vector<2x96xf32> to vector<2x32xf32>
    %360 = vector.extract_strided_slice %320 {offsets = [0, 0], sizes = [2, 32], strides = [1, 1]} : vector<2x96xf32> to vector<2x32xf32>
    %361 = arith.addf %359, %360 : vector<2x32xf32>
    %362 = arith.negf %361 : vector<2x32xf32>
    %363 = math.exp %362 : vector<2x32xf32>
    %cst_95 = arith.constant 1.000000e+00 : f32
    %364 = vector.broadcast %cst_95 : f32 to vector<2x32xf32>
    %365 = arith.addf %364, %363 : vector<2x32xf32>
    %366 = arith.divf %364, %365 : vector<2x32xf32>
    %367 = vector.extract_strided_slice %358 {offsets = [0, 32], sizes = [2, 32], strides = [1, 1]} : vector<2x96xf32> to vector<2x32xf32>
    %368 = vector.extract_strided_slice %320 {offsets = [0, 32], sizes = [2, 32], strides = [1, 1]} : vector<2x96xf32> to vector<2x32xf32>
    %369 = arith.addf %367, %368 : vector<2x32xf32>
    %370 = arith.negf %369 : vector<2x32xf32>
    %371 = math.exp %370 : vector<2x32xf32>
    %cst_96 = arith.constant 1.000000e+00 : f32
    %372 = vector.broadcast %cst_96 : f32 to vector<2x32xf32>
    %373 = arith.addf %372, %371 : vector<2x32xf32>
    %374 = arith.divf %372, %373 : vector<2x32xf32>
    %375 = vector.extract_strided_slice %358 {offsets = [0, 64], sizes = [2, 32], strides = [1, 1]} : vector<2x96xf32> to vector<2x32xf32>
    %376 = vector.extract_strided_slice %320 {offsets = [0, 64], sizes = [2, 32], strides = [1, 1]} : vector<2x96xf32> to vector<2x32xf32>
    %377 = arith.mulf %366, %376 : vector<2x32xf32>
    %378 = arith.addf %375, %377 : vector<2x32xf32>
    %379 = math.tanh %378 : vector<2x32xf32>
    %cst_97 = arith.constant 1.000000e+00 : f32
    %380 = vector.broadcast %cst_97 : f32 to vector<2x32xf32>
    %381 = arith.subf %380, %374 : vector<2x32xf32>
    %382 = arith.mulf %381, %379 : vector<2x32xf32>
    %383 = arith.mulf %374, %312 : vector<2x32xf32>
    %384 = arith.addf %382, %383 : vector<2x32xf32>
    %385 = arith.truncf %384 : vector<2x32xf32> to vector<2x32xbf16>
    %cst_98 = arith.constant dense<0.000000e+00> : vector<2x192xf32>
    %386 = tpu.matmul %385, %57, %cst_98 {dimension_numbers = #tpu.dot_dimension_numbers<[1], [0], [0], [1], [0, 0, 1, 1], [], []>} : vector<2x32xbf16>, vector<32x192xbf16>, vector<2x192xf32> -> vector<2x192xf32>
    %387 = vector.extract_strided_slice %386 {offsets = [0, 0], sizes = [2, 96], strides = [1, 1]} : vector<2x192xf32> to vector<2x96xf32>
    %388 = vector.broadcast %60 : vector<1x96xf32> to vector<2x96xf32>
    %389 = arith.addf %387, %388 : vector<2x96xf32>
    %390 = vector.extract_strided_slice %386 {offsets = [0, 96], sizes = [2, 96], strides = [1, 1]} : vector<2x192xf32> to vector<2x96xf32>
    %391 = vector.broadcast %59 : vector<1x96xf32> to vector<2x96xf32>
    %392 = arith.addf %390, %391 : vector<2x96xf32>
    %393 = vector.extract_strided_slice %389 {offsets = [0, 0], sizes = [2, 32], strides = [1, 1]} : vector<2x96xf32> to vector<2x32xf32>
    %394 = vector.extract_strided_slice %350 {offsets = [0, 0], sizes = [2, 32], strides = [1, 1]} : vector<2x96xf32> to vector<2x32xf32>
    %395 = arith.addf %393, %394 : vector<2x32xf32>
    %396 = arith.negf %395 : vector<2x32xf32>
    %397 = math.exp %396 : vector<2x32xf32>
    %cst_99 = arith.constant 1.000000e+00 : f32
    %398 = vector.broadcast %cst_99 : f32 to vector<2x32xf32>
    %399 = arith.addf %398, %397 : vector<2x32xf32>
    %400 = arith.divf %398, %399 : vector<2x32xf32>
    %401 = vector.extract_strided_slice %389 {offsets = [0, 32], sizes = [2, 32], strides = [1, 1]} : vector<2x96xf32> to vector<2x32xf32>
    %402 = vector.extract_strided_slice %350 {offsets = [0, 32], sizes = [2, 32], strides = [1, 1]} : vector<2x96xf32> to vector<2x32xf32>
    %403 = arith.addf %401, %402 : vector<2x32xf32>
    %404 = arith.negf %403 : vector<2x32xf32>
    %405 = math.exp %404 : vector<2x32xf32>
    %cst_100 = arith.constant 1.000000e+00 : f32
    %406 = vector.broadcast %cst_100 : f32 to vector<2x32xf32>
    %407 = arith.addf %406, %405 : vector<2x32xf32>
    %408 = arith.divf %406, %407 : vector<2x32xf32>
    %409 = vector.extract_strided_slice %389 {offsets = [0, 64], sizes = [2, 32], strides = [1, 1]} : vector<2x96xf32> to vector<2x32xf32>
    %410 = vector.extract_strided_slice %350 {offsets = [0, 64], sizes = [2, 32], strides = [1, 1]} : vector<2x96xf32> to vector<2x32xf32>
    %411 = arith.mulf %400, %410 : vector<2x32xf32>
    %412 = arith.addf %409, %411 : vector<2x32xf32>
    %413 = math.tanh %412 : vector<2x32xf32>
    %cst_101 = arith.constant 1.000000e+00 : f32
    %414 = vector.broadcast %cst_101 : f32 to vector<2x32xf32>
    %415 = arith.subf %414, %408 : vector<2x32xf32>
    %416 = arith.mulf %415, %413 : vector<2x32xf32>
    %417 = arith.mulf %408, %346 : vector<2x32xf32>
    %418 = arith.addf %416, %417 : vector<2x32xf32>
    %419 = arith.truncf %418 : vector<2x32xf32> to vector<2x32xbf16>
    %cst_102 = arith.constant dense<0.000000e+00> : vector<2x96xf32>
    %420 = tpu.matmul %419, %58, %cst_102 {dimension_numbers = #tpu.dot_dimension_numbers<[1], [0], [0], [1], [0, 0, 1, 1], [], []>} : vector<2x32xbf16>, vector<32x96xbf16>, vector<2x96xf32> -> vector<2x96xf32>
    %421 = vector.broadcast %61 : vector<1x96xf32> to vector<2x96xf32>
    %422 = arith.addf %420, %421 : vector<2x96xf32>
    %c2_i32_103 = arith.constant 2 : i32
    %423 = vector.broadcast %c2_i32_103 : i32 to vector<2x1xi32>
    %424 = arith.subi %62, %423 : vector<2x1xi32>
    %c4_i32 = arith.constant 4 : i32
    %425 = vector.broadcast %c4_i32 : i32 to vector<2x1xi32>
    %426 = arith.cmpi eq, %424, %425 : vector<2x1xi32>
    %427 = vector.shape_cast %426 : vector<2x1xi1> to vector<2x1xi1>
    %428 = vector.broadcast %427 : vector<2x1xi1> to vector<2x32xi1>
    %429 = arith.select %428, %418, %357 : vector<2x32xi1>, vector<2x32xf32>
    %c10 = arith.constant 10 : index
    %c0_104 = arith.constant 0 : index
    %430 = vector.load %arg22[%c10, %c0_104] : memref<16x96xf32, #tpu.memory_space<vmem>>, vector<2x96xf32>
    %431 = vector.extract_strided_slice %430 {offsets = [0, 0], sizes = [2, 32], strides = [1, 1]} : vector<2x96xf32> to vector<2x32xf32>
    %432 = vector.extract_strided_slice %392 {offsets = [0, 0], sizes = [2, 32], strides = [1, 1]} : vector<2x96xf32> to vector<2x32xf32>
    %433 = arith.addf %431, %432 : vector<2x32xf32>
    %434 = arith.negf %433 : vector<2x32xf32>
    %435 = math.exp %434 : vector<2x32xf32>
    %cst_105 = arith.constant 1.000000e+00 : f32
    %436 = vector.broadcast %cst_105 : f32 to vector<2x32xf32>
    %437 = arith.addf %436, %435 : vector<2x32xf32>
    %438 = arith.divf %436, %437 : vector<2x32xf32>
    %439 = vector.extract_strided_slice %430 {offsets = [0, 32], sizes = [2, 32], strides = [1, 1]} : vector<2x96xf32> to vector<2x32xf32>
    %440 = vector.extract_strided_slice %392 {offsets = [0, 32], sizes = [2, 32], strides = [1, 1]} : vector<2x96xf32> to vector<2x32xf32>
    %441 = arith.addf %439, %440 : vector<2x32xf32>
    %442 = arith.negf %441 : vector<2x32xf32>
    %443 = math.exp %442 : vector<2x32xf32>
    %cst_106 = arith.constant 1.000000e+00 : f32
    %444 = vector.broadcast %cst_106 : f32 to vector<2x32xf32>
    %445 = arith.addf %444, %443 : vector<2x32xf32>
    %446 = arith.divf %444, %445 : vector<2x32xf32>
    %447 = vector.extract_strided_slice %430 {offsets = [0, 64], sizes = [2, 32], strides = [1, 1]} : vector<2x96xf32> to vector<2x32xf32>
    %448 = vector.extract_strided_slice %392 {offsets = [0, 64], sizes = [2, 32], strides = [1, 1]} : vector<2x96xf32> to vector<2x32xf32>
    %449 = arith.mulf %438, %448 : vector<2x32xf32>
    %450 = arith.addf %447, %449 : vector<2x32xf32>
    %451 = math.tanh %450 : vector<2x32xf32>
    %cst_107 = arith.constant 1.000000e+00 : f32
    %452 = vector.broadcast %cst_107 : f32 to vector<2x32xf32>
    %453 = arith.subf %452, %446 : vector<2x32xf32>
    %454 = arith.mulf %453, %451 : vector<2x32xf32>
    %455 = arith.mulf %446, %384 : vector<2x32xf32>
    %456 = arith.addf %454, %455 : vector<2x32xf32>
    %457 = arith.truncf %456 : vector<2x32xf32> to vector<2x32xbf16>
    %cst_108 = arith.constant dense<0.000000e+00> : vector<2x192xf32>
    %458 = tpu.matmul %457, %57, %cst_108 {dimension_numbers = #tpu.dot_dimension_numbers<[1], [0], [0], [1], [0, 0, 1, 1], [], []>} : vector<2x32xbf16>, vector<32x192xbf16>, vector<2x192xf32> -> vector<2x192xf32>
    %459 = vector.extract_strided_slice %458 {offsets = [0, 0], sizes = [2, 96], strides = [1, 1]} : vector<2x192xf32> to vector<2x96xf32>
    %460 = vector.broadcast %60 : vector<1x96xf32> to vector<2x96xf32>
    %461 = arith.addf %459, %460 : vector<2x96xf32>
    %462 = vector.extract_strided_slice %458 {offsets = [0, 96], sizes = [2, 96], strides = [1, 1]} : vector<2x192xf32> to vector<2x96xf32>
    %463 = vector.broadcast %59 : vector<1x96xf32> to vector<2x96xf32>
    %464 = arith.addf %462, %463 : vector<2x96xf32>
    %465 = vector.extract_strided_slice %461 {offsets = [0, 0], sizes = [2, 32], strides = [1, 1]} : vector<2x96xf32> to vector<2x32xf32>
    %466 = vector.extract_strided_slice %422 {offsets = [0, 0], sizes = [2, 32], strides = [1, 1]} : vector<2x96xf32> to vector<2x32xf32>
    %467 = arith.addf %465, %466 : vector<2x32xf32>
    %468 = arith.negf %467 : vector<2x32xf32>
    %469 = math.exp %468 : vector<2x32xf32>
    %cst_109 = arith.constant 1.000000e+00 : f32
    %470 = vector.broadcast %cst_109 : f32 to vector<2x32xf32>
    %471 = arith.addf %470, %469 : vector<2x32xf32>
    %472 = arith.divf %470, %471 : vector<2x32xf32>
    %473 = vector.extract_strided_slice %461 {offsets = [0, 32], sizes = [2, 32], strides = [1, 1]} : vector<2x96xf32> to vector<2x32xf32>
    %474 = vector.extract_strided_slice %422 {offsets = [0, 32], sizes = [2, 32], strides = [1, 1]} : vector<2x96xf32> to vector<2x32xf32>
    %475 = arith.addf %473, %474 : vector<2x32xf32>
    %476 = arith.negf %475 : vector<2x32xf32>
    %477 = math.exp %476 : vector<2x32xf32>
    %cst_110 = arith.constant 1.000000e+00 : f32
    %478 = vector.broadcast %cst_110 : f32 to vector<2x32xf32>
    %479 = arith.addf %478, %477 : vector<2x32xf32>
    %480 = arith.divf %478, %479 : vector<2x32xf32>
    %481 = vector.extract_strided_slice %461 {offsets = [0, 64], sizes = [2, 32], strides = [1, 1]} : vector<2x96xf32> to vector<2x32xf32>
    %482 = vector.extract_strided_slice %422 {offsets = [0, 64], sizes = [2, 32], strides = [1, 1]} : vector<2x96xf32> to vector<2x32xf32>
    %483 = arith.mulf %472, %482 : vector<2x32xf32>
    %484 = arith.addf %481, %483 : vector<2x32xf32>
    %485 = math.tanh %484 : vector<2x32xf32>
    %cst_111 = arith.constant 1.000000e+00 : f32
    %486 = vector.broadcast %cst_111 : f32 to vector<2x32xf32>
    %487 = arith.subf %486, %480 : vector<2x32xf32>
    %488 = arith.mulf %487, %485 : vector<2x32xf32>
    %489 = arith.mulf %480, %418 : vector<2x32xf32>
    %490 = arith.addf %488, %489 : vector<2x32xf32>
    %491 = arith.truncf %490 : vector<2x32xf32> to vector<2x32xbf16>
    %cst_112 = arith.constant dense<0.000000e+00> : vector<2x96xf32>
    %492 = tpu.matmul %491, %58, %cst_112 {dimension_numbers = #tpu.dot_dimension_numbers<[1], [0], [0], [1], [0, 0, 1, 1], [], []>} : vector<2x32xbf16>, vector<32x96xbf16>, vector<2x96xf32> -> vector<2x96xf32>
    %493 = vector.broadcast %61 : vector<1x96xf32> to vector<2x96xf32>
    %494 = arith.addf %492, %493 : vector<2x96xf32>
    %c2_i32_113 = arith.constant 2 : i32
    %495 = vector.broadcast %c2_i32_113 : i32 to vector<2x1xi32>
    %496 = arith.subi %62, %495 : vector<2x1xi32>
    %c5_i32 = arith.constant 5 : i32
    %497 = vector.broadcast %c5_i32 : i32 to vector<2x1xi32>
    %498 = arith.cmpi eq, %496, %497 : vector<2x1xi32>
    %499 = vector.shape_cast %498 : vector<2x1xi1> to vector<2x1xi1>
    %500 = vector.broadcast %499 : vector<2x1xi1> to vector<2x32xi1>
    %501 = arith.select %500, %490, %429 : vector<2x32xi1>, vector<2x32xf32>
    %c12 = arith.constant 12 : index
    %c0_114 = arith.constant 0 : index
    %502 = vector.load %arg22[%c12, %c0_114] : memref<16x96xf32, #tpu.memory_space<vmem>>, vector<2x96xf32>
    %503 = vector.extract_strided_slice %502 {offsets = [0, 0], sizes = [2, 32], strides = [1, 1]} : vector<2x96xf32> to vector<2x32xf32>
    %504 = vector.extract_strided_slice %464 {offsets = [0, 0], sizes = [2, 32], strides = [1, 1]} : vector<2x96xf32> to vector<2x32xf32>
    %505 = arith.addf %503, %504 : vector<2x32xf32>
    %506 = arith.negf %505 : vector<2x32xf32>
    %507 = math.exp %506 : vector<2x32xf32>
    %cst_115 = arith.constant 1.000000e+00 : f32
    %508 = vector.broadcast %cst_115 : f32 to vector<2x32xf32>
    %509 = arith.addf %508, %507 : vector<2x32xf32>
    %510 = arith.divf %508, %509 : vector<2x32xf32>
    %511 = vector.extract_strided_slice %502 {offsets = [0, 32], sizes = [2, 32], strides = [1, 1]} : vector<2x96xf32> to vector<2x32xf32>
    %512 = vector.extract_strided_slice %464 {offsets = [0, 32], sizes = [2, 32], strides = [1, 1]} : vector<2x96xf32> to vector<2x32xf32>
    %513 = arith.addf %511, %512 : vector<2x32xf32>
    %514 = arith.negf %513 : vector<2x32xf32>
    %515 = math.exp %514 : vector<2x32xf32>
    %cst_116 = arith.constant 1.000000e+00 : f32
    %516 = vector.broadcast %cst_116 : f32 to vector<2x32xf32>
    %517 = arith.addf %516, %515 : vector<2x32xf32>
    %518 = arith.divf %516, %517 : vector<2x32xf32>
    %519 = vector.extract_strided_slice %502 {offsets = [0, 64], sizes = [2, 32], strides = [1, 1]} : vector<2x96xf32> to vector<2x32xf32>
    %520 = vector.extract_strided_slice %464 {offsets = [0, 64], sizes = [2, 32], strides = [1, 1]} : vector<2x96xf32> to vector<2x32xf32>
    %521 = arith.mulf %510, %520 : vector<2x32xf32>
    %522 = arith.addf %519, %521 : vector<2x32xf32>
    %523 = math.tanh %522 : vector<2x32xf32>
    %cst_117 = arith.constant 1.000000e+00 : f32
    %524 = vector.broadcast %cst_117 : f32 to vector<2x32xf32>
    %525 = arith.subf %524, %518 : vector<2x32xf32>
    %526 = arith.mulf %525, %523 : vector<2x32xf32>
    %527 = arith.mulf %518, %456 : vector<2x32xf32>
    %528 = arith.addf %526, %527 : vector<2x32xf32>
    %529 = arith.truncf %528 : vector<2x32xf32> to vector<2x32xbf16>
    %cst_118 = arith.constant dense<0.000000e+00> : vector<2x192xf32>
    %530 = tpu.matmul %529, %57, %cst_118 {dimension_numbers = #tpu.dot_dimension_numbers<[1], [0], [0], [1], [0, 0, 1, 1], [], []>} : vector<2x32xbf16>, vector<32x192xbf16>, vector<2x192xf32> -> vector<2x192xf32>
    %531 = vector.extract_strided_slice %530 {offsets = [0, 0], sizes = [2, 96], strides = [1, 1]} : vector<2x192xf32> to vector<2x96xf32>
    %532 = vector.broadcast %60 : vector<1x96xf32> to vector<2x96xf32>
    %533 = arith.addf %531, %532 : vector<2x96xf32>
    %534 = vector.extract_strided_slice %530 {offsets = [0, 96], sizes = [2, 96], strides = [1, 1]} : vector<2x192xf32> to vector<2x96xf32>
    %535 = vector.broadcast %59 : vector<1x96xf32> to vector<2x96xf32>
    %536 = arith.addf %534, %535 : vector<2x96xf32>
    %537 = vector.extract_strided_slice %533 {offsets = [0, 0], sizes = [2, 32], strides = [1, 1]} : vector<2x96xf32> to vector<2x32xf32>
    %538 = vector.extract_strided_slice %494 {offsets = [0, 0], sizes = [2, 32], strides = [1, 1]} : vector<2x96xf32> to vector<2x32xf32>
    %539 = arith.addf %537, %538 : vector<2x32xf32>
    %540 = arith.negf %539 : vector<2x32xf32>
    %541 = math.exp %540 : vector<2x32xf32>
    %cst_119 = arith.constant 1.000000e+00 : f32
    %542 = vector.broadcast %cst_119 : f32 to vector<2x32xf32>
    %543 = arith.addf %542, %541 : vector<2x32xf32>
    %544 = arith.divf %542, %543 : vector<2x32xf32>
    %545 = vector.extract_strided_slice %533 {offsets = [0, 32], sizes = [2, 32], strides = [1, 1]} : vector<2x96xf32> to vector<2x32xf32>
    %546 = vector.extract_strided_slice %494 {offsets = [0, 32], sizes = [2, 32], strides = [1, 1]} : vector<2x96xf32> to vector<2x32xf32>
    %547 = arith.addf %545, %546 : vector<2x32xf32>
    %548 = arith.negf %547 : vector<2x32xf32>
    %549 = math.exp %548 : vector<2x32xf32>
    %cst_120 = arith.constant 1.000000e+00 : f32
    %550 = vector.broadcast %cst_120 : f32 to vector<2x32xf32>
    %551 = arith.addf %550, %549 : vector<2x32xf32>
    %552 = arith.divf %550, %551 : vector<2x32xf32>
    %553 = vector.extract_strided_slice %533 {offsets = [0, 64], sizes = [2, 32], strides = [1, 1]} : vector<2x96xf32> to vector<2x32xf32>
    %554 = vector.extract_strided_slice %494 {offsets = [0, 64], sizes = [2, 32], strides = [1, 1]} : vector<2x96xf32> to vector<2x32xf32>
    %555 = arith.mulf %544, %554 : vector<2x32xf32>
    %556 = arith.addf %553, %555 : vector<2x32xf32>
    %557 = math.tanh %556 : vector<2x32xf32>
    %cst_121 = arith.constant 1.000000e+00 : f32
    %558 = vector.broadcast %cst_121 : f32 to vector<2x32xf32>
    %559 = arith.subf %558, %552 : vector<2x32xf32>
    %560 = arith.mulf %559, %557 : vector<2x32xf32>
    %561 = arith.mulf %552, %490 : vector<2x32xf32>
    %562 = arith.addf %560, %561 : vector<2x32xf32>
    %563 = arith.truncf %562 : vector<2x32xf32> to vector<2x32xbf16>
    %cst_122 = arith.constant dense<0.000000e+00> : vector<2x96xf32>
    %564 = tpu.matmul %563, %58, %cst_122 {dimension_numbers = #tpu.dot_dimension_numbers<[1], [0], [0], [1], [0, 0, 1, 1], [], []>} : vector<2x32xbf16>, vector<32x96xbf16>, vector<2x96xf32> -> vector<2x96xf32>
    %565 = vector.broadcast %61 : vector<1x96xf32> to vector<2x96xf32>
    %566 = arith.addf %564, %565 : vector<2x96xf32>
    %c2_i32_123 = arith.constant 2 : i32
    %567 = vector.broadcast %c2_i32_123 : i32 to vector<2x1xi32>
    %568 = arith.subi %62, %567 : vector<2x1xi32>
    %c6_i32 = arith.constant 6 : i32
    %569 = vector.broadcast %c6_i32 : i32 to vector<2x1xi32>
    %570 = arith.cmpi eq, %568, %569 : vector<2x1xi32>
    %571 = vector.shape_cast %570 : vector<2x1xi1> to vector<2x1xi1>
    %572 = vector.broadcast %571 : vector<2x1xi1> to vector<2x32xi1>
    %573 = arith.select %572, %562, %501 : vector<2x32xi1>, vector<2x32xf32>
    %c14 = arith.constant 14 : index
    %c0_124 = arith.constant 0 : index
    %574 = vector.load %arg22[%c14, %c0_124] : memref<16x96xf32, #tpu.memory_space<vmem>>, vector<2x96xf32>
    %575 = vector.extract_strided_slice %574 {offsets = [0, 0], sizes = [2, 32], strides = [1, 1]} : vector<2x96xf32> to vector<2x32xf32>
    %576 = vector.extract_strided_slice %536 {offsets = [0, 0], sizes = [2, 32], strides = [1, 1]} : vector<2x96xf32> to vector<2x32xf32>
    %577 = arith.addf %575, %576 : vector<2x32xf32>
    %578 = arith.negf %577 : vector<2x32xf32>
    %579 = math.exp %578 : vector<2x32xf32>
    %cst_125 = arith.constant 1.000000e+00 : f32
    %580 = vector.broadcast %cst_125 : f32 to vector<2x32xf32>
    %581 = arith.addf %580, %579 : vector<2x32xf32>
    %582 = arith.divf %580, %581 : vector<2x32xf32>
    %583 = vector.extract_strided_slice %574 {offsets = [0, 32], sizes = [2, 32], strides = [1, 1]} : vector<2x96xf32> to vector<2x32xf32>
    %584 = vector.extract_strided_slice %536 {offsets = [0, 32], sizes = [2, 32], strides = [1, 1]} : vector<2x96xf32> to vector<2x32xf32>
    %585 = arith.addf %583, %584 : vector<2x32xf32>
    %586 = arith.negf %585 : vector<2x32xf32>
    %587 = math.exp %586 : vector<2x32xf32>
    %cst_126 = arith.constant 1.000000e+00 : f32
    %588 = vector.broadcast %cst_126 : f32 to vector<2x32xf32>
    %589 = arith.addf %588, %587 : vector<2x32xf32>
    %590 = arith.divf %588, %589 : vector<2x32xf32>
    %591 = vector.extract_strided_slice %574 {offsets = [0, 64], sizes = [2, 32], strides = [1, 1]} : vector<2x96xf32> to vector<2x32xf32>
    %592 = vector.extract_strided_slice %536 {offsets = [0, 64], sizes = [2, 32], strides = [1, 1]} : vector<2x96xf32> to vector<2x32xf32>
    %593 = arith.mulf %582, %592 : vector<2x32xf32>
    %594 = arith.addf %591, %593 : vector<2x32xf32>
    %595 = math.tanh %594 : vector<2x32xf32>
    %cst_127 = arith.constant 1.000000e+00 : f32
    %596 = vector.broadcast %cst_127 : f32 to vector<2x32xf32>
    %597 = arith.subf %596, %590 : vector<2x32xf32>
    %598 = arith.mulf %597, %595 : vector<2x32xf32>
    %599 = arith.mulf %590, %528 : vector<2x32xf32>
    %600 = arith.addf %598, %599 : vector<2x32xf32>
    %601 = arith.truncf %600 : vector<2x32xf32> to vector<2x32xbf16>
    %cst_128 = arith.constant dense<0.000000e+00> : vector<2x192xf32>
    %602 = tpu.matmul %601, %57, %cst_128 {dimension_numbers = #tpu.dot_dimension_numbers<[1], [0], [0], [1], [0, 0, 1, 1], [], []>} : vector<2x32xbf16>, vector<32x192xbf16>, vector<2x192xf32> -> vector<2x192xf32>
    %603 = vector.extract_strided_slice %602 {offsets = [0, 0], sizes = [2, 96], strides = [1, 1]} : vector<2x192xf32> to vector<2x96xf32>
    %604 = vector.broadcast %60 : vector<1x96xf32> to vector<2x96xf32>
    %605 = arith.addf %603, %604 : vector<2x96xf32>
    %606 = vector.extract_strided_slice %605 {offsets = [0, 0], sizes = [2, 32], strides = [1, 1]} : vector<2x96xf32> to vector<2x32xf32>
    %607 = vector.extract_strided_slice %566 {offsets = [0, 0], sizes = [2, 32], strides = [1, 1]} : vector<2x96xf32> to vector<2x32xf32>
    %608 = arith.addf %606, %607 : vector<2x32xf32>
    %609 = arith.negf %608 : vector<2x32xf32>
    %610 = math.exp %609 : vector<2x32xf32>
    %cst_129 = arith.constant 1.000000e+00 : f32
    %611 = vector.broadcast %cst_129 : f32 to vector<2x32xf32>
    %612 = arith.addf %611, %610 : vector<2x32xf32>
    %613 = arith.divf %611, %612 : vector<2x32xf32>
    %614 = vector.extract_strided_slice %605 {offsets = [0, 32], sizes = [2, 32], strides = [1, 1]} : vector<2x96xf32> to vector<2x32xf32>
    %615 = vector.extract_strided_slice %566 {offsets = [0, 32], sizes = [2, 32], strides = [1, 1]} : vector<2x96xf32> to vector<2x32xf32>
    %616 = arith.addf %614, %615 : vector<2x32xf32>
    %617 = arith.negf %616 : vector<2x32xf32>
    %618 = math.exp %617 : vector<2x32xf32>
    %cst_130 = arith.constant 1.000000e+00 : f32
    %619 = vector.broadcast %cst_130 : f32 to vector<2x32xf32>
    %620 = arith.addf %619, %618 : vector<2x32xf32>
    %621 = arith.divf %619, %620 : vector<2x32xf32>
    %622 = vector.extract_strided_slice %605 {offsets = [0, 64], sizes = [2, 32], strides = [1, 1]} : vector<2x96xf32> to vector<2x32xf32>
    %623 = vector.extract_strided_slice %566 {offsets = [0, 64], sizes = [2, 32], strides = [1, 1]} : vector<2x96xf32> to vector<2x32xf32>
    %624 = arith.mulf %613, %623 : vector<2x32xf32>
    %625 = arith.addf %622, %624 : vector<2x32xf32>
    %626 = math.tanh %625 : vector<2x32xf32>
    %cst_131 = arith.constant 1.000000e+00 : f32
    %627 = vector.broadcast %cst_131 : f32 to vector<2x32xf32>
    %628 = arith.subf %627, %621 : vector<2x32xf32>
    %629 = arith.mulf %628, %626 : vector<2x32xf32>
    %630 = arith.mulf %621, %562 : vector<2x32xf32>
    %631 = arith.addf %629, %630 : vector<2x32xf32>
    %c2_i32_132 = arith.constant 2 : i32
    %632 = vector.broadcast %c2_i32_132 : i32 to vector<2x1xi32>
    %633 = arith.subi %62, %632 : vector<2x1xi32>
    %c7_i32 = arith.constant 7 : i32
    %634 = vector.broadcast %c7_i32 : i32 to vector<2x1xi32>
    %635 = arith.cmpi eq, %633, %634 : vector<2x1xi32>
    %636 = vector.shape_cast %635 : vector<2x1xi1> to vector<2x1xi1>
    %637 = vector.broadcast %636 : vector<2x1xi1> to vector<2x32xi1>
    %638 = arith.select %637, %631, %573 : vector<2x32xi1>, vector<2x32xf32>
    %c0_133 = arith.constant 0 : index
    %c0_134 = arith.constant 0 : index
    %639 = vector.load %arg21[%c0_133, %c0_134] : memref<2x32xf32, #tpu.memory_space<vmem>>, vector<2x32xf32>
    tpu.vector_store %arg21[%c0_133, %c0_134], %638 {strides = array<i32>} : memref<2x32xf32, #tpu.memory_space<vmem>>, vector<2x32xf32>,
    return
  }
}

</mosaic_0001>

<bundles_post_ra>
// kernel: program_encoder_forward.1
= control target key start
LH: loop header
LB: loop body
LE: loop exit
PB: predicated region body
PF: predicated region fallthrough
CT: control target
= control target key end

     0   :  { %s2738_s0 = inlined_call_operand.vmem [shape: s32[2,1], index: 0, kind: input, shape index: {}]   ;;  %s2739_s1 = inlined_call_operand.vmem [shape: s32[16,1], index: 1, kind: input, shape index: {}]   ;;  %s2740_s2 = inlined_call_operand.vmem [shape: s32[32,1], index: 2, kind: input, shape index: {}]   ;;  %s2741_s3 = inlined_call_operand.vmem [shape: s32[32,1], index: 3, kind: input, shape index: {}]   ;;  %s2742_s4 = inlined_call_operand.vmem [shape: f32[10,32], index: 4, kind: input, shape index: {}]   ;;  %s2743_s5 = inlined_call_operand.vmem [shape: f32[12,32], index: 5, kind: input, shape index: {}]   ;;  %s2744_s6 = inlined_call_operand.vmem [shape: f32[6,32], index: 6, kind: input, shape index: {}]   ;;  %s2745_s7 = inlined_call_operand.vmem [shape: bf16[32,32], index: 7, kind: input, shape index: {}]   ;;  %s2746_s8 = inlined_call_operand.vmem [shape: bf16[32,32], index: 8, kind: input, shape index: {}]   ;;  %s2747_s9 = inlined_call_operand.vmem [shape: bf16[32,32], index: 9, kind: input, shape index: {}]   ;;  %s2748_s10 = inlined_call_operand.vmem [shape: f32[1,32], index: 10, kind: input, shape index: {}]   ;;  %s2749_s11 = inlined_call_operand.vmem [shape: bf16[32,32], index: 11, kind: input, shape index: {}]   ;;  %s2750_s12 = inlined_call_operand.vmem [shape: f32[1,32], index: 12, kind: input, shape index: {}]   ;;  %s2751_s13 = inlined_call_operand.vmem [shape: bf16[32,96], index: 13, kind: input, shape index: {}]   ;;  %s2752_s14 = inlined_call_operand.vmem [shape: f32[1,96], index: 14, kind: input, shape index: {}]   ;;  %s2753_s15 = inlined_call_operand.vmem [shape: bf16[32,192], index: 15, kind: input, shape index: {}]   ;;  %s2754_s16 = inlined_call_operand.vmem [shape: f32[1,96], index: 16, kind: input, shape index: {}]   ;;  %s2755_s17 = inlined_call_operand.vmem [shape: f32[1,96], index: 17, kind: input, shape index: {}]   ;;  %s2756_s18 = inlined_call_operand.vmem [shape: bf16[32,96], index: 18, kind: input, shape index: {}]   ;;  %s2757_s19 = inlined_call_operand.vmem [shape: f32[1,96], index: 19, kind: input, shape index: {}]   ;;  %s2758_s20 = inlined_call_operand.vmem [shape: f32[16,32], index: 20, kind: output, shape index: {0}]   ;;  %s2759_s21 = inlined_call_operand.hbm [shape: f32[2,32], index: 21, kind: output, shape index: {1}]  }
   0x1   :  { %2765 = sst [smem:[#allocation6_spill]] %s2738_s0 }
   0x2   :  { %2766 = sst [smem:[#allocation7_spill]] %s2739_s1 }
   0x3   :  { %2767 = sst [smem:[#allocation8_spill]] %s2740_s2 }
   0x4   :  { %2768 = sst [smem:[#allocation9_spill]] %s2741_s3 }
   0x5   :  { %2769 = sst [smem:[#allocation10_spill]] %s2742_s4 }
   0x6   :  { %2770 = sst [smem:[#allocation11_spill]] %s2743_s5 }
   0x7   :  { %s2771_s26 = sld [smem:[#allocation8_spill]]  ;;  %v2168_v2 = vmov 0   ;;  %vm239_vm0 = vcmask 1043456  }
   0x8   :  { %2000 = vset.pattern.permute.xlu1 %v2168_v2  ;;  %1999 = vset.pattern.permute.xlu0 %v2168_v2  ;;  %s2772_s30 = sld [smem:[#allocation11_spill]] }
   0x9   :  { %2001 = vset.pattern.permute.xlu2 %v2168_v2 }
   0xd   :  { %v122_v0 = vld [vmem:[%s2771_s26 + $0x8] sm:$0xff]  ;;  %v121_v1 = vld [vmem:[%s2771_s26] sm:$0xff]  ;;  %v123_v3 = vld [vmem:[%s2771_s26 + $0x10] sm:$0xff] }
   0xe   :  { %131 = vperm.xlu1 %2000, %v122_v0   ;;  %128 = vperm.xlu0 %1999, %v121_v1   ;;  %v126_v4 = vld [vmem:[%s2772_s30 + $0x8] sm:$0xf] }
   0xf   :  { %134 = vperm.xlu2 %2001, %v123_v3   ;;  %1857 = vmatpush.msk.msra.mxu2 %vm239_vm0, %v126_v4 }
  0x10   :  { %27 = vsyncpa [#allocation4], 0  ;;  %s2773_s23 = sld [smem:[#allocation9_spill]]  ;;  %v124_v8 = vld [vmem:[%s2771_s26 + $0x18] sm:$0xff]  ;;  %v125_v12 = vld [vmem:[%s2772_s30] sm:$0xff]  ;;  %vm193_vm1 = vcmask 1045504   ;;  %v73_v16 = vlaneseq }
  0x11   :  { %s2774_s0 = sld [smem:[#allocation7_spill]]  ;;  %258 = vmatpush.msra.mxu2 %v125_v12  ;;  %v155_v13 = vld [vmem:[%s2744_s6] sm:$0x3f]  ;;  %vm94_vm2 = vcmask 1041408   ;;  %vm226_vm3 = vcmask 97280   ;;  %v2169_v20 = vmov 0.0  }
  0x12   :  { %1852 = vmatpush.msk.msra.mxu1 %vm193_vm1, %v155_v13  ;;  %s2775_s3 = sld [smem:[#allocation10_spill]]  ;;  %v74_v17 = vand.u32 127, %v73_v16  ;;  %vm180_vm6 = vcmask 48128   ;;  %vm87_vm10 = vcmask 80896   ;;  %v1980_v39 = vld [vmem:[%s2746_s8 + $0x8] sm:$0xff]  ;;  %v1979_v40 = vld [vmem:[%s2746_s8] sm:$0xff] }
  0x13   :  { %304 = vmatpush.bf16.msra.mxu3 %v1980_v39  ;;  %v1978_v41 = vld [vmem:[%s2745_s7 + $0x8] sm:$0xff]  ;;  %v1977_v43 = vld [vmem:[%s2745_s7] sm:$0xff]  ;;  %vm294_vm0 = vcmask 261120   ;;  %s2170_s4 = smov 64   ;;  %vm465_vm1 = vcmask 785408   ;;  %s1828_s27 = sshll.u32 %s2759_s21, 4  ;;  %s1829_s27 = int_to_ptr.hbm [resolvable:$true] %s1828_s27 }
  0x14   :  { %v1982_v42 = vld [vmem:[%s2747_s9 + $0x8] sm:$0xff]  ;;  %v1981_v44 = vld [vmem:[%s2747_s9] sm:$0xff] }
  0x15   :  { %v1984_v62 = vld [vmem:[%s2749_s11 + $0x8] sm:$0xff]  ;;  %v1983_v63 = vld [vmem:[%s2749_s11] sm:$0xff] }
  0x16   :  { %v152_v5 = vld [vmem:[%s2773_s23 + $0x8] sm:$0xff]  ;;  %v151_v6 = vld [vmem:[%s2773_s23] sm:$0xff]  ;;  %v153_v7 = vld [vmem:[%s2773_s23 + $0x10] sm:$0xff]  ;;  %415 = vmatpush.bf16.msrb.mxu1 %v1984_v62 }
  0x17   :  { %160 = vperm.xlu1 %2000, %v152_v5   ;;  %157 = vperm.xlu0 %1999, %v151_v6   ;;  %v69_v9 = vld [vmem:[%s2774_s0] sm:$0xff]  ;;  %v154_v10 = vld [vmem:[%s2773_s23 + $0x18] sm:$0xff]  ;;  %v70_v11 = vld [vmem:[%s2774_s0 + $0x8] sm:$0xff]  ;;  %s2776_s23 = sld [smem:[#allocation6_spill]] }
  0x18   :  { %163 = vperm.xlu2 %2001, %v153_v7   ;;  %v72_v14 = vld [vmem:[%s2775_s3 + $0x8] sm:$0x3]  ;;  %v71_v15 = vld [vmem:[%s2775_s3] sm:$0xff]  ;;  %305 = vmatpush.bf16.msra.mxu3 %v1979_v40  ;;  %v1912_v62 = vld [vmem:[%s2753_s15 + $0x8] sm:$0xf0] }
  0x19   :  { %1841 = vmatpush.msk.msra.mxu0 %vm94_vm2, %v72_v14 }
  0x1a   :  { %416 = vmatpush.bf16.msrb.mxu1 %v1983_v63 }
  0x1b   :  { %113 = vmatpush.msra.mxu0 %v71_v15 }
  0x1c   :  { %367 = vmatpush.bf16.msrb.mxu3 %v1982_v42 }
  0x1d   :  { %333 = vmatpush.bf16.msrb.mxu0 %v1978_v41 }
  0x1f   :  { %137 = vperm.xlu0 %1999, %v124_v8   ;;  %76 = vperm.xlu1 %2000, %v69_v9   ;;  %v2002_v8 = vld [vmem:[%s2748_s10] ss:$0 sm:$0xff] }
  0x20   :  { %166 = vperm.xlu2 %2001, %v154_v10   ;;  %368 = vmatpush.bf16.msrb.mxu3 %v1981_v44 }
  0x21   :  { %334 = vmatpush.bf16.msrb.mxu0 %v1977_v43 }
  0x27   :  { %79 = vperm.xlu0 %1999, %v70_v11  }
  0x69   :  { %v135_v22 = vpop.permute.xlu2 %134 }
  0x6a   :  { %vm141_vm8 = vcmp.eq.s32.totalorder %v135_v22, %v74_v17 }
  0x6b   :  { %v1846_v29 = vsel %vm141_vm8, 1.0, %v2169_v20 }
  0x72   :  { %v164_v30 = vpop.permute.xlu2 %163 }
  0x73   :  { %vm170_vm12 = vcmp.eq.s32.totalorder %v164_v30, %v74_v17 }
  0x74   :  { %v1850_v34 = vsel %vm170_vm12, 1.0, %v2169_v20 }
  0x7a   :  { %v167_v37 = vpop.permute.xlu2 %166 }
  0x7b   :  { %vm171_vm15 = vcmp.eq.s32.totalorder %v167_v37, %v74_v17 }
  0x7c   :  { %v1851_v38 = vsel %vm171_vm15, 1.0, %v2169_v20 }
  0x80   :  { %v132_v18 = vpop.permute.xlu1 %131  ;;  %v129_v19 = vpop.permute.xlu0 %128 }
  0x81   :  { %vm139_vm4 = vcmp.eq.s32.totalorder %v129_v19, %v74_v17  ;;  %vm140_vm5 = vcmp.eq.s32.totalorder %v132_v18, %v74_v17  ;;  %v1985_v18 = vld [vmem:[%s2751_s13] sm:$0xff] }
  0x82   :  { %v1844_v21 = vsel %vm139_vm4, 1.0, %v2169_v20  ;;  %v1845_v23 = vsel %vm140_vm5, 1.0, %v2169_v20  ;;  %v2004_v19 = vld [vmem:[%s2754_s16] ss:$0 sm:$0xff] }
  0x83   :  { %1858 = vmatmul.msk.f32.vlgmr.msra.gmra.mxu2 %vm226_vm3, %v1844_v21  ;;  %504 = vrot.lane.b32.xlu1 %v2004_v19, %s2170_s4 }
  0x89   :  { %v161_v24 = vpop.permute.xlu1 %160  ;;  %v158_v25 = vpop.permute.xlu0 %157 }
  0x8a   :  { %vm168_vm7 = vcmp.eq.s32.totalorder %v158_v25, %v74_v17  ;;  %vm169_vm9 = vcmp.eq.s32.totalorder %v161_v24, %v74_v17 }
  0x8b   :  { %v1848_v26 = vsel %vm168_vm7, 1.0, %v2169_v20  ;;  %1859 = vmatmul.msk.f32.gmra.mxu2 %vm226_vm3, %v1845_v23  ;;  %v1849_v31 = vsel %vm169_vm9, 1.0, %v2169_v20 }
  0x8c   :  { %1853 = vmatmul.msk.f32.vlgmr.msra.gmra.mxu1 %vm180_vm6, %v1848_v26 }
  0x91   :  { %v138_v27 = vpop.permute.xlu0 %137  ;;  %v77_v28 = vpop.permute.xlu1 %76 }
  0x92   :  { %vm81_vm11 = vcmp.eq.s32.totalorder %v77_v28, %v74_v17  ;;  %vm142_vm13 = vcmp.eq.s32.totalorder %v138_v27, %v74_v17  ;;  %v2005_v28 = vld [vmem:[%s2752_s14] ss:$0 sm:$0xff]  ;;  %s2171_s14 = smov 96  }
  0x93   :  { %v1839_v32 = vsel %vm81_vm11, 1.0, %v2169_v20  ;;  %1860 = vmatmul.msk.f32.gmra.mxu2 %vm226_vm3, %v1846_v29  ;;  %v1847_v36 = vsel %vm142_vm13, 1.0, %v2169_v20 }
  0x94   :  { %1842 = vmatmul.msk.f32.vlgmr.msra.gmra.mxu0 %vm87_vm10, %v1839_v32  ;;  %1854 = vmatmul.msk.f32.gmra.mxu1 %vm180_vm6, %v1849_v31 }
  0x99   :  { %v80_v33 = vpop.permute.xlu0 %79 }
  0x9a   :  { %vm82_vm14 = vcmp.eq.s32.totalorder %v80_v33, %v74_v17  ;;  %v1986_v17 = vld [vmem:[%s2751_s13 + $0x8] sm:$0xff] }
  0x9b   :  { %v1840_v35 = vsel %vm82_vm14, 1.0, %v2169_v20  ;;  %1861 = vmatmul.msk.f32.gmra.mxu2 %vm226_vm3, %v1847_v36  ;;  %457 = vmatpush.bf16.msra.mxu0 %v1986_v17  ;;  %v2003_v20 = vld [vmem:[%s2750_s12] ss:$0 sm:$0xff] }
  0x9c   :  { %1843 = vmatmul.msk.f32.gmra.mxu0 %vm87_vm10, %v1840_v35  ;;  %1855 = vmatmul.msk.f32.gmra.mxu1 %vm180_vm6, %v1850_v34 }
  0x9f   :  { %458 = vmatpush.bf16.msra.mxu0 %v1985_v18 }
  0xa4   :  { %1856 = vmatmul.msk.f32.gmra.mxu1 %vm180_vm6, %v1851_v38 }
 0x106   :  { %v260_v45 = vpop.f32.mrf.mxu2 }
 0x109   :  { %v214_v46 = vpop.f32.mrf.mxu1 }
 0x10a   :  { %v261_v50 = vadd.f32 %v260_v45, %v214_v46  ;;  %v505_v46 = vpop.permute.xlu1 %504 }
 0x10e   :  { %v263_v47 = vpop.f32.mrf.mxu2 }
 0x111   :  { %v115_v48 = vpop.f32.mrf.mxu0  ;;  %v217_v49 = vpop.f32.mrf.mxu1 }
 0x112   :  { %v264_v51 = vadd.f32 %v263_v47, %v217_v49 }
 0x114   :  { %v277_v52 = vpack.c.bf16 %v264_v51, %v261_v50 }
 0x116   :  { %1870 = vmatmul.msk.bf16.vlgmr.msra.gmra.mxu3 %vm294_vm0, %v277_v52  ;;  %v266_v53 = vpop.f32.mrf.mxu2 }
 0x119   :  { %v118_v54 = vpop.f32.mrf.mxu0  ;;  %v220_v55 = vpop.f32.mrf.mxu1 }
 0x11a   :  { %v272_v56 = vpack.c.bf16 %v118_v54, %v115_v48  ;;  %v267_v59 = vadd.f32 %v266_v53, %v220_v55  ;;  %v1918_v53 = vld [vmem:[%s2753_s15 + $0x10] sm:$0xf]  ;;  %v1990_v54 = vld [vmem:[%s2753_s15 + $0x14] sm:$0xf0]  ;;  %v1910_v55 = vld [vmem:[%s2753_s15] sm:$0xf] }
 0x11c   :  { %1879 = vmatmul.msk.bf16.vlgmr.msrb.gmra.mxu0 %vm294_vm0, %v272_v56  ;;  %v2410_v56 = vor.u32 %v1990_v54, %v1918_v53 }
 0x11e   :  { %v269_v57 = vpop.f32.mrf.mxu2  ;;  %555 = vmatpush.bf16.msrb.mxu2 %v2410_v56  ;;  %745 = vmatpush.bf16.msrb.mxu0 %v2410_v56 }
 0x121   :  { %v223_v58 = vpop.f32.mrf.mxu1 }
 0x122   :  { %v270_v60 = vadd.f32 %v269_v57, %v223_v58  ;;  %v1988_v57 = vld [vmem:[%s2753_s15 + $0x4] sm:$0xf0]  ;;  %v1989_v58 = vld [vmem:[%s2753_s15 + $0x14] sm:$0xf] }
 0x123   :  { %v2430_v63 = vor.u32 %v1988_v57, %v1910_v55 }
 0x124   :  { %v341_v61 = vpack.c.bf16 %v270_v60, %v267_v59  ;;  %v1920_v59 = vld [vmem:[%s2753_s15 + $0x18] sm:$0xf0] }
 0x125   :  { %v2421_v60 = vor.u32 %v1989_v58, %v1920_v59  ;;  %556 = vmatpush.bf16.msrb.mxu2 %v2430_v63  ;;  %746 = vmatpush.bf16.msrb.mxu0 %v2430_v63 }
 0x126   :  { %1888 = vmatmul.msk.bf16.vlgmr.msrb.gmra.mxu3 %vm294_vm0, %v341_v61  ;;  %v1987_v61 = vld [vmem:[%s2753_s15 + $0x4] sm:$0xf]  ;;  %s2172_s15 = smov 32  }
 0x127   :  { %568 = vmatpush.bf16.msra.mxu3 %v2421_v60 }
 0x129   :  { %758 = vmatpush.bf16.msra.mxu2 %v2421_v60 }
 0x199   :  { %v307_v0 = vpop.f32.mrf.mxu3  ;;  %v336_v3 = vpop.f32.mrf.mxu0 }
 0x19a   :  { %v337_v5 = vadd.f32 %v336_v3, %v307_v0  ;;  %v2434_v0 = vor.u32 %v1987_v61, %v1912_v62 }
 0x19c   :  { %569 = vmatpush.bf16.msra.mxu3 %v2434_v0  ;;  %759 = vmatpush.bf16.msra.mxu2 %v2434_v0 }
 0x1a1   :  { %v309_v1 = vpop.f32.mrf.mxu3  ;;  %v338_v6 = vpop.f32.mrf.mxu0 }
 0x1a2   :  { %v339_v9 = vadd.f32 %v338_v6, %v309_v1 }
 0x1a9   :  { %v370_v4 = vpop.f32.mrf.mxu3 }
 0x1aa   :  { %v375_v7 = vadd.f32 %v370_v4, %v337_v5 }
 0x1ac   :  { %v381_v10 = vadd.f32 %v2002_v8, %v375_v7 }
 0x1ae   :  { %2008 = vtanh.f32 %v381_v10 }
 0x1b1   :  { %v372_v11 = vpop.f32.mrf.mxu3 }
 0x1b2   :  { %v376_v12 = vadd.f32 %v372_v11, %v339_v9 }
 0x1b4   :  { %v382_v13 = vadd.f32 %v2002_v8, %v376_v12  ;;  %v2009_v14 = vpop.eup %2008 }
 0x1b6   :  { %2010 = vtanh.f32 %v382_v13 }
 0x1bc   :  { %v2011_v15 = vpop.eup %2010 }
 0x1bd   :  { %v385_v16 = vpack.c.bf16 %v2011_v15, %v2009_v14 }
 0x1bf   :  { %1897 = vmatmul.msk.bf16.vlgmr.msrb.gmra.mxu1 %vm294_vm0, %v385_v16  ;;  %v2460_v16 = vld [vmem:[%s2757_s19] ss:$0 sm:$0xff] }
 0x23c   :  { %v418_v21 = vpop.f32.mrf.mxu1 }
 0x23d   :  { %v419_v22 = vadd.f32 %v2003_v20, %v418_v21 }
 0x23f   :  { %2012 = vtanh.f32 %v419_v22 }
 0x244   :  { %v420_v23 = vpop.f32.mrf.mxu1 }
 0x245   :  { %v2013_v24 = vpop.eup %2012  ;;  %v421_v25 = vadd.f32 %v2003_v20, %v420_v23 }
 0x246   :  { %425 = vst.msk [vmem:[%s2758_s20] sm:$0xff] %vm294_vm0, %v2013_v24 }
 0x247   :  { %2014 = vtanh.f32 %v421_v25 }
 0x24d   :  { %v2015_v26 = vpop.eup %2014 }
 0x24e   :  { %426 = vst.msk [vmem:[%s2758_s20 + $0x8] sm:$0xff] %vm294_vm0, %v2015_v26  ;;  %v427_v27 = vpack.c.bf16 %v2015_v26, %v2013_v24 }
 0x250   :  { %1906 = vmatmul.msk.bf16.vlgmr.msra.gmra.mxu0 %vm294_vm0, %v427_v27 }
 0x251   :  { %927 = vmatpush.bf16.msra.mxu0 %v2421_v60 }
 0x255   :  { %928 = vmatpush.bf16.msra.mxu0 %v2434_v0 }
 0x2cd   :  { %v460_v29 = vpop.f32.mrf.mxu0 }
 0x2ce   :  { %v461_v30 = vadd.f32 %v2005_v28, %v460_v29 }
 0x2d0   :  { %466 = vst.msk [vmem:[#allocation2] sm:$0xff] %vm465_vm1, %v461_v30 }
 0x2d5   :  { %v462_v31 = vpop.f32.mrf.mxu0 }
 0x2d6   :  { %v463_v32 = vadd.f32 %v2005_v28, %v462_v31 }
 0x2d7   :  { %v480_v33 = vld [vmem:[#allocation2] sm:$0x3]  ;;  %v665_v17 = vld [vmem:[#allocation2 + $0x2] sm:$0x3] }
 0x2d8   :  { %467 = vst.msk [vmem:[#allocation2 + $0x8] sm:$0xff] %vm465_vm1, %v463_v32  ;;  %v484_v34 = vadd.f32 %v2004_v19, %v480_v33 }
 0x2da   :  { %v1907_v35 = vmul.f32 -1.442695, %v484_v34 }
 0x2dc   :  { %2016 = vpow2.f32 %v1907_v35  ;;  %v2468_v35 = vld [vmem:[%s2755_s17] ss:$0 sm:$0xff] }
 0x2e2   :  { %v2017_v36 = vpop.eup %2016 }
 0x2e3   :  { %v488_v37 = vadd.f32 1.0, %v2017_v36 }
 0x2e5   :  { %2018 = vrcp.f32 %v488_v37  ;;  %v500_v41 = vand.u32 2147483648, %v488_v37  ;;  %v498_v43 = vand.u32 2147483647, %v488_v37  ;;  %vm494_vm3 = vweird.f32 %v488_v37 }
 0x2e7   :  { %v501_v45 = vor.u32 1.1754944e-38, %v500_v41  ;;  %vm499_vm5 = vcmp.eq.f32.partialorder %v498_v43, 8.507059e+37 }
 0x2eb   :  { %v2019_v38 = vpop.eup %2018 }
 0x2ec   :  { %v490_v39 = vmul.f32 %v2019_v38, %v488_v37  ;;  %vm495_vm2 = vweird.f32 %v2019_v38 }
 0x2ed   :  { %vm496_vm4 = vmor %vm494_vm3, %vm495_vm2 }
 0x2ee   :  { %v491_v40 = vsub.f32 1.0, %v490_v39 }
 0x2f0   :  { %v492_v42 = vmul.f32 %v2019_v38, %v491_v40 }
 0x2f2   :  { %v493_v44 = vadd.f32 %v2019_v38, %v492_v42 }
 0x2f4   :  { %v497_v47 = vsel %vm496_vm4, %v2019_v38, %v493_v44 }
 0x2f5   :  { %v502_v48 = vsel %vm499_vm5, %v501_v45, %v497_v47 }
 0x2f6   :  { %v507_v49 = vmul.f32 %v505_v46, %v502_v48  ;;  %v514_v1 = vsub.f32 1.0, %v502_v48  ;;  %v520_v4 = vmul.f32 0.0, %v502_v48 }
 0x2f8   :  { %509 = vrot.lane.b32.xlu2 %v507_v49, %s2170_s4 }
 0x300   :  { %579 = vrot.lane.b32.xlu2 %v2004_v19, %s2171_s14 }
 0x352   :  { %v510_v50 = vpop.permute.xlu2 %509 }
 0x353   :  { %v512_v51 = vadd.f32 %v510_v50, %v480_v33 }
 0x355   :  { %2020 = vtanh.f32 %v512_v51 }
 0x35a   :  { %v2450_v9 = vpop.permute.xlu2 %579 }
 0x35b   :  { %v2021_v52 = vpop.eup %2020 }
 0x35c   :  { %516 = vrot.lane.b32.xlu0 %v2021_v52, %s2171_s14 }
 0x3ce   :  { %v517_v3 = vpop.permute.xlu0 %516 }
 0x3cf   :  { %v519_v5 = vmul.f32 %v517_v3, %v514_v1 }
 0x3d1   :  { %v2443_v6 = vadd.f32 %v520_v4, %v519_v5 }
 0x3d3   :  { %v522_v7 = vpack.c.bf16 %v2443_v6, %v2443_v6 }
 0x3d5   :  { %524 = vrot.lane.b32.xlu1 %v522_v7, %s2171_s14 }
 0x447   :  { %v525_v8 = vpop.permute.xlu1 %524 }
 0x448   :  { %1924 = vmatmul.msk.bf16.vlgmr.msrb.gmra.mxu2 %vm294_vm0, %v525_v8  ;;  %1925 = vmatmul.msk.bf16.vlgmr.msra.gmra.mxu3 %vm294_vm0, %v525_v8 }
 0x4cb   :  { %v558_v10 = vpop.f32.mrf.mxu2  ;;  %v571_v11 = vpop.f32.mrf.mxu3 }
 0x4cc   :  { %v583_v12 = vadd.f32 %v2450_v9, %v571_v11  ;;  %v582_v13 = vadd.f32 %v2450_v9, %v558_v10  ;;  %v578_v36 = vadd.f32 %v2468_v35, %v558_v10 }
 0x4ce   :  { %714 = vrot.lane.b32.xlu1 %v583_v12, %s2171_s14  ;;  %667 = vrot.lane.b32.xlu0 %v582_v13, %s2172_s15  ;;  %v587_v37 = vadd.f32 %v2460_v16, %v578_v36 }
 0x4d0   :  { %v1926_v38 = vmul.f32 -1.442695, %v587_v37 }
 0x4d3   :  { %v560_v14 = vpop.f32.mrf.mxu2  ;;  %v573_v15 = vpop.f32.mrf.mxu3 }
 0x4d6   :  { %691 = vrot.lane.b32.xlu0 %v583_v12, %s2172_s15 }
 0x4de   :  { %607 = vrot.lane.b32.xlu0 %v2460_v16, %s2170_s4 }
 0x540   :  { %v668_v18 = vpop.permute.xlu0 %667  ;;  %v715_v32 = vpop.permute.xlu1 %714 }
 0x541   :  { %v670_v19 = vadd.f32 %v668_v18, %v665_v17 }
 0x543   :  { %v1937_v20 = vmul.f32 -1.442695, %v670_v19 }
 0x545   :  { %2022 = vpow2.f32 %v1937_v20 }
 0x548   :  { %v692_v46 = vpop.permute.xlu0 %691 }
 0x549   :  { %v694_v58 = vadd.f32 %v692_v46, %v665_v17 }
 0x54b   :  { %v2023_v21 = vpop.eup %2022  ;;  %v1938_v59 = vmul.f32 -1.442695, %v694_v58 }
 0x54c   :  { %v674_v22 = vadd.f32 1.0, %v2023_v21 }
 0x54e   :  { %2024 = vrcp.f32 %v674_v22  ;;  %v686_v26 = vand.u32 2147483648, %v674_v22  ;;  %v684_v28 = vand.u32 2147483647, %v674_v22  ;;  %vm680_vm7 = vweird.f32 %v674_v22 }
 0x54f   :  { %2026 = vpow2.f32 %v1926_v38 }
 0x550   :  { %v687_v30 = vor.u32 1.1754944e-38, %v686_v26  ;;  %vm685_vm9 = vcmp.eq.f32.partialorder %v684_v28, 8.507059e+37  ;;  %v608_v54 = vpop.permute.xlu0 %607 }
 0x554   :  { %v2025_v23 = vpop.eup %2024 }
 0x555   :  { %v676_v24 = vmul.f32 %v2025_v23, %v674_v22  ;;  %vm681_vm6 = vweird.f32 %v2025_v23  ;;  %v2027_v39 = vpop.eup %2026 }
 0x556   :  { %vm682_vm8 = vmor %vm680_vm7, %vm681_vm6  ;;  %v591_v40 = vadd.f32 1.0, %v2027_v39 }
 0x557   :  { %v677_v25 = vsub.f32 1.0, %v676_v24  ;;  %v2484_v24 = vld [vmem:[%s2756_s18 + $0x8] sm:$0xff] }
 0x558   :  { %2028 = vrcp.f32 %v591_v40  ;;  %v603_v50 = vand.u32 2147483648, %v591_v40  ;;  %vm597_vm11 = vweird.f32 %v591_v40  ;;  %v601_v51 = vand.u32 2147483647, %v591_v40  ;;  %650 = vmatpush.bf16.msra.mxu1 %v2484_v24  ;;  %820 = vmatpush.bf16.msrb.mxu3 %v2484_v24 }
 0x559   :  { %v678_v27 = vmul.f32 %v2025_v23, %v677_v25  ;;  %989 = vmatpush.bf16.msrb.mxu2 %v2484_v24 }
 0x55a   :  { %v604_v53 = vor.u32 1.1754944e-38, %v603_v50  ;;  %vm602_vm13 = vcmp.eq.f32.partialorder %v601_v51, 8.507059e+37 }
 0x55b   :  { %v679_v29 = vadd.f32 %v2025_v23, %v678_v27 }
 0x55d   :  { %v683_v31 = vsel %vm682_vm8, %v2025_v23, %v679_v29 }
 0x55e   :  { %v688_v33 = vsel %vm685_vm9, %v687_v30, %v683_v31  ;;  %v2029_v41 = vpop.eup %2028  ;;  %v2500_v31 = vld [vmem:[%s2756_s18] sm:$0xff] }
 0x55f   :  { %v717_v34 = vmul.f32 %v715_v32, %v688_v33  ;;  %v593_v42 = vmul.f32 %v2029_v41, %v591_v40  ;;  %vm598_vm10 = vweird.f32 %v2029_v41  ;;  %651 = vmatpush.bf16.msra.mxu1 %v2500_v31  ;;  %821 = vmatpush.bf16.msrb.mxu3 %v2500_v31  ;;  %v834_v40 = vld [vmem:[#allocation2 + $0x4] sm:$0x3] }
 0x560   :  { %vm599_vm12 = vmor %vm597_vm11, %vm598_vm10  ;;  %990 = vmatpush.bf16.msrb.mxu2 %v2500_v31 }
 0x561   :  { %719 = vrot.lane.b32.xlu2 %v717_v34, %s2170_s4  ;;  %v594_v43 = vsub.f32 1.0, %v593_v42 }
 0x563   :  { %v595_v47 = vmul.f32 %v2029_v41, %v594_v43  ;;  %914 = vmatpush.bf16.msrb.mxu1 %v2410_v56  ;;  %1083 = vmatpush.bf16.msra.mxu3 %v2410_v56 }
 0x565   :  { %v596_v48 = vadd.f32 %v2029_v41, %v595_v47 }
 0x567   :  { %v600_v52 = vsel %vm599_vm12, %v2029_v41, %v596_v48  ;;  %915 = vmatpush.bf16.msrb.mxu1 %v2430_v63  ;;  %1084 = vmatpush.bf16.msra.mxu3 %v2430_v63 }
 0x568   :  { %v605_v55 = vsel %vm602_vm13, %v604_v53, %v600_v52 }
 0x569   :  { %v610_v57 = vmul.f32 %v608_v54, %v605_v55  ;;  %v617_v25 = vsub.f32 1.0, %v605_v55  ;;  %v623_v27 = vmul.f32 0.0, %v605_v55 }
 0x5bb   :  { %v720_v44 = vpop.permute.xlu2 %719 }
 0x5bc   :  { %v722_v45 = vadd.f32 %v720_v44, %v665_v17 }
 0x5be   :  { %2030 = vtanh.f32 %v722_v45 }
 0x5bf   :  { %2032 = vpow2.f32 %v1938_v59 }
 0x5c4   :  { %v2031_v49 = vpop.eup %2030 }
 0x5c5   :  { %726 = vrot.lane.b32.xlu1 %v2031_v49, %s2171_s14  ;;  %v2033_v61 = vpop.eup %2032 }
 0x5c6   :  { %v698_v62 = vadd.f32 1.0, %v2033_v61 }
 0x5c8   :  { %2034 = vrcp.f32 %v698_v62  ;;  %v710_v8 = vand.u32 2147483648, %v698_v62  ;;  %vm704_vm15 = vweird.f32 %v698_v62  ;;  %v708_v10 = vand.u32 2147483647, %v698_v62 }
 0x5ca   :  { %v711_v12 = vor.u32 1.1754944e-38, %v710_v8  ;;  %vm709_vm2 = vcmp.eq.f32.partialorder %v708_v10, 8.507059e+37 }
 0x5cd   :  { %612 = vrot.lane.b32.xlu1 %v610_v57, %s2170_s4 }
 0x5ce   :  { %v2035_v1 = vpop.eup %2034 }
 0x5cf   :  { %v700_v3 = vmul.f32 %v2035_v1, %v698_v62  ;;  %vm705_vm14 = vweird.f32 %v2035_v1 }
 0x5d0   :  { %vm706_vm1 = vmor %vm704_vm15, %vm705_vm14 }
 0x5d1   :  { %v701_v4 = vsub.f32 1.0, %v700_v3 }
 0x5d3   :  { %v702_v5 = vmul.f32 %v2035_v1, %v701_v4 }
 0x5d5   :  { %v703_v7 = vadd.f32 %v2035_v1, %v702_v5 }
 0x5d7   :  { %v707_v11 = vsel %vm706_vm1, %v2035_v1, %v703_v7 }
 0x5d8   :  { %v712_v13 = vsel %vm709_vm2, %v711_v12, %v707_v11 }
 0x5d9   :  { %v724_v14 = vsub.f32 1.0, %v712_v13  ;;  %v730_v18 = vmul.f32 %v712_v13, %v2443_v6 }
 0x637   :  { %v727_v15 = vpop.permute.xlu1 %726 }
 0x638   :  { %v729_v17 = vmul.f32 %v727_v15, %v724_v14 }
 0x63a   :  { %v2475_v19 = vadd.f32 %v730_v18, %v729_v17 }
 0x63c   :  { %v732_v20 = vpack.c.bf16 %v2475_v19, %v2475_v19 }
 0x63e   :  { %734 = vrot.lane.b32.xlu2 %v732_v20, %s2171_s14 }
 0x63f   :  { %v613_v21 = vpop.permute.xlu1 %612 }
 0x640   :  { %v615_v22 = vadd.f32 %v613_v21, %v578_v36 }
 0x642   :  { %2036 = vtanh.f32 %v615_v22 }
 0x648   :  { %v2037_v23 = vpop.eup %2036 }
 0x649   :  { %619 = vrot.lane.b32.xlu2 %v2037_v23, %s2171_s14 }
 0x698   :  { %v735_v6 = vpop.permute.xlu2 %734 }
 0x699   :  { %1939 = vmatmul.msk.bf16.vlgmr.msrb.gmra.mxu0 %vm294_vm0, %v735_v6  ;;  %1940 = vmatmul.msk.bf16.vlgmr.msra.gmra.mxu2 %vm294_vm0, %v735_v6 }
 0x69a   :  { %1158 = vmatpush.bf16.msrb.mxu0 %v2484_v24  ;;  %1252 = vmatpush.bf16.msra.mxu2 %v2410_v56 }
 0x69e   :  { %1159 = vmatpush.bf16.msrb.mxu0 %v2500_v31  ;;  %1253 = vmatpush.bf16.msra.mxu2 %v2430_v63 }
 0x6a3   :  { %v620_v26 = vpop.permute.xlu2 %619 }
 0x6a4   :  { %v622_v28 = vmul.f32 %v620_v26, %v617_v25 }
 0x6a6   :  { %v2492_v29 = vadd.f32 %v623_v27, %v622_v28 }
 0x6a8   :  { %v625_v30 = vpack.c.bf16 %v2492_v29, %v2492_v29 }
 0x6aa   :  { %627 = vrot.lane.b32.xlu0 %v625_v30, %s2171_s14 }
 0x716   :  { %v748_v32 = vpop.f32.mrf.mxu0 }
 0x717   :  { %v766_v33 = vadd.f32 %v748_v32, %v2450_v9  ;;  %v765_v1 = vadd.f32 %v2468_v35, %v748_v32 }
 0x719   :  { %836 = vrot.lane.b32.xlu1 %v766_v33, %s2172_s15 }
 0x71c   :  { %v761_v34 = vpop.f32.mrf.mxu2  ;;  %v628_v36 = vpop.permute.xlu0 %627 }
 0x71d   :  { %v767_v37 = vadd.f32 %v761_v34, %v2450_v9  ;;  %1935 = vmatmul.msk.bf16.vlgmr.msra.gmra.mxu1 %vm294_vm0, %v628_v36 }
 0x71e   :  { %v750_v38 = vpop.f32.mrf.mxu0  ;;  %1096 = vmatpush.bf16.msra.mxu1 %v2421_v60 }
 0x71f   :  { %883 = vrot.lane.b32.xlu2 %v767_v37, %s2171_s14 }
 0x721   :  { %860 = vrot.lane.b32.xlu1 %v767_v37, %s2172_s15 }
 0x722   :  { %1097 = vmatpush.bf16.msra.mxu1 %v2434_v0 }
 0x724   :  { %v763_v39 = vpop.f32.mrf.mxu2 }
 0x779   :  { %v884_v59 = vpop.permute.xlu2 %883 }
 0x78b   :  { %v837_v41 = vpop.permute.xlu1 %836 }
 0x78c   :  { %v839_v42 = vadd.f32 %v837_v41, %v834_v40 }
 0x78e   :  { %v1943_v43 = vmul.f32 -1.442695, %v839_v42 }
 0x790   :  { %2038 = vpow2.f32 %v1943_v43 }
 0x793   :  { %v861_v15 = vpop.permute.xlu1 %860 }
 0x794   :  { %v863_v27 = vadd.f32 %v861_v15, %v834_v40 }
 0x796   :  { %v2039_v44 = vpop.eup %2038  ;;  %v1944_v28 = vmul.f32 -1.442695, %v863_v27 }
 0x797   :  { %v843_v45 = vadd.f32 1.0, %v2039_v44 }
 0x799   :  { %2040 = vrcp.f32 %v843_v45  ;;  %v855_v52 = vand.u32 2147483648, %v843_v45  ;;  %v853_v54 = vand.u32 2147483647, %v843_v45  ;;  %vm849_vm4 = vweird.f32 %v843_v45 }
 0x79a   :  { %v653_v46 = vpop.f32.mrf.mxu1 }
 0x79b   :  { %v654_v47 = vadd.f32 %v2460_v16, %v653_v46  ;;  %v856_v57 = vor.u32 1.1754944e-38, %v855_v52  ;;  %vm854_vm6 = vcmp.eq.f32.partialorder %v853_v54, 8.507059e+37 }
 0x79d   :  { %789 = vrot.lane.b32.xlu1 %v654_v47, %s2170_s4  ;;  %v768_v3 = vadd.f32 %v765_v1, %v654_v47 }
 0x79f   :  { %v2041_v48 = vpop.eup %2040  ;;  %v1941_v4 = vmul.f32 -1.442695, %v768_v3 }
 0x7a0   :  { %v845_v49 = vmul.f32 %v2041_v48, %v843_v45  ;;  %vm850_vm3 = vweird.f32 %v2041_v48 }
 0x7a1   :  { %vm851_vm5 = vmor %vm849_vm4, %vm850_vm3  ;;  %2042 = vpow2.f32 %v1941_v4 }
 0x7a2   :  { %v655_v50 = vpop.f32.mrf.mxu1  ;;  %v846_v51 = vsub.f32 1.0, %v845_v49 }
 0x7a4   :  { %v847_v53 = vmul.f32 %v2041_v48, %v846_v51 }
 0x7a6   :  { %v848_v55 = vadd.f32 %v2041_v48, %v847_v53 }
 0x7a7   :  { %v2043_v5 = vpop.eup %2042 }
 0x7a8   :  { %v852_v58 = vsel %vm851_vm5, %v2041_v48, %v848_v55  ;;  %v772_v7 = vadd.f32 1.0, %v2043_v5 }
 0x7a9   :  { %v857_v61 = vsel %vm854_vm6, %v856_v57, %v852_v58 }
 0x7aa   :  { %v886_v62 = vmul.f32 %v884_v59, %v857_v61  ;;  %2044 = vrcp.f32 %v772_v7  ;;  %v784_v20 = vand.u32 2147483648, %v772_v7  ;;  %vm778_vm8 = vweird.f32 %v772_v7 }
 0x7ab   :  { %v782_v21 = vand.u32 2147483647, %v772_v7 }
 0x7ac   :  { %888 = vrot.lane.b32.xlu0 %v886_v62, %s2170_s4  ;;  %v785_v23 = vor.u32 1.1754944e-38, %v784_v20 }
 0x7ad   :  { %vm783_vm10 = vcmp.eq.f32.partialorder %v782_v21, 8.507059e+37 }
 0x7b0   :  { %v2045_v8 = vpop.eup %2044 }
 0x7b1   :  { %v774_v10 = vmul.f32 %v2045_v8, %v772_v7  ;;  %vm779_vm7 = vweird.f32 %v2045_v8 }
 0x7b2   :  { %vm780_vm9 = vmor %vm778_vm8, %vm779_vm7 }
 0x7b3   :  { %v775_v11 = vsub.f32 1.0, %v774_v10 }
 0x7b5   :  { %v776_v14 = vmul.f32 %v2045_v8, %v775_v11 }
 0x7b7   :  { %v777_v17 = vadd.f32 %v2045_v8, %v776_v14 }
 0x7b9   :  { %v781_v22 = vsel %vm780_vm9, %v2045_v8, %v777_v17  ;;  %v1003_v8 = vld [vmem:[#allocation2 + $0x6] sm:$0x3] }
 0x7ba   :  { %v786_v25 = vsel %vm783_vm10, %v785_v23, %v781_v22 }
 0x7bb   :  { %v805_v55 = vmul.f32 %v786_v25, %v2492_v29 }
 0x80f   :  { %v790_v6 = vpop.permute.xlu1 %789 }
 0x810   :  { %v792_v26 = vmul.f32 %v790_v6, %v786_v25 }
 0x81e   :  { %v889_v12 = vpop.permute.xlu0 %888 }
 0x81f   :  { %v891_v13 = vadd.f32 %v889_v12, %v834_v40 }
 0x821   :  { %2046 = vtanh.f32 %v891_v13 }
 0x822   :  { %2048 = vpow2.f32 %v1944_v28 }
 0x827   :  { %v2047_v18 = vpop.eup %2046 }
 0x828   :  { %895 = vrot.lane.b32.xlu2 %v2047_v18, %s2171_s14  ;;  %v2049_v30 = vpop.eup %2048 }
 0x829   :  { %v867_v32 = vadd.f32 1.0, %v2049_v30 }
 0x82b   :  { %2050 = vrcp.f32 %v867_v32  ;;  %v879_v39 = vand.u32 2147483648, %v867_v32  ;;  %vm873_vm12 = vweird.f32 %v867_v32  ;;  %v877_v41 = vand.u32 2147483647, %v867_v32 }
 0x82d   :  { %v880_v43 = vor.u32 1.1754944e-38, %v879_v39  ;;  %vm878_vm14 = vcmp.eq.f32.partialorder %v877_v41, 8.507059e+37 }
 0x830   :  { %794 = vrot.lane.b32.xlu2 %v792_v26, %s2170_s4 }
 0x831   :  { %v2051_v33 = vpop.eup %2050 }
 0x832   :  { %v869_v34 = vmul.f32 %v2051_v33, %v867_v32  ;;  %vm874_vm11 = vweird.f32 %v2051_v33 }
 0x833   :  { %vm875_vm13 = vmor %vm873_vm12, %vm874_vm11 }
 0x834   :  { %v870_v36 = vsub.f32 1.0, %v869_v34 }
 0x836   :  { %v871_v37 = vmul.f32 %v2051_v33, %v870_v36 }
 0x838   :  { %v872_v38 = vadd.f32 %v2051_v33, %v871_v37 }
 0x83a   :  { %v876_v42 = vsel %vm875_vm13, %v2051_v33, %v872_v38 }
 0x83b   :  { %v881_v44 = vsel %vm878_vm14, %v880_v43, %v876_v42 }
 0x83c   :  { %v893_v40 = vsub.f32 1.0, %v881_v44  ;;  %v899_v47 = vmul.f32 %v881_v44, %v2475_v19  ;;  %v799_v19 = vsub.f32 1.0, %v786_v25 }
 0x882   :  { %v896_v45 = vpop.permute.xlu2 %895 }
 0x883   :  { %v898_v46 = vmul.f32 %v896_v45, %v893_v40 }
 0x885   :  { %v2527_v48 = vadd.f32 %v899_v47, %v898_v46 }
 0x887   :  { %v901_v49 = vpack.c.bf16 %v2527_v48, %v2527_v48 }
 0x889   :  { %903 = vrot.lane.b32.xlu0 %v901_v49, %s2171_s14 }
 0x88a   :  { %v795_v50 = vpop.permute.xlu2 %794 }
 0x88b   :  { %v797_v51 = vadd.f32 %v795_v50, %v765_v1 }
 0x88d   :  { %2052 = vtanh.f32 %v797_v51 }
 0x893   :  { %v2053_v52 = vpop.eup %2052 }
 0x894   :  { %801 = vrot.lane.b32.xlu0 %v2053_v52, %s2171_s14 }
 0x8fb   :  { %v904_v53 = vpop.permute.xlu0 %903 }
 0x8fc   :  { %1945 = vmatmul.msk.bf16.vlgmr.msrb.gmra.mxu1 %vm294_vm0, %v904_v53  ;;  %1946 = vmatmul.msk.bf16.vlgmr.msra.gmra.mxu0 %vm294_vm0, %v904_v53 }
 0x8fd   :  { %1421 = vmatpush.bf16.msra.mxu0 %v2410_v56  ;;  %1327 = vmatpush.bf16.msrb.mxu1 %v2484_v24 }
 0x901   :  { %1422 = vmatpush.bf16.msra.mxu0 %v2430_v63  ;;  %1328 = vmatpush.bf16.msrb.mxu1 %v2500_v31 }
 0x906   :  { %v802_v54 = vpop.permute.xlu0 %801 }
 0x907   :  { %v804_v57 = vmul.f32 %v802_v54, %v799_v19 }
 0x909   :  { %v2540_v58 = vadd.f32 %v805_v55, %v804_v57 }
 0x90b   :  { %v807_v59 = vpack.c.bf16 %v2540_v58, %v2540_v58 }
 0x90d   :  { %809 = vrot.lane.b32.xlu1 %v807_v59, %s2171_s14 }
 0x979   :  { %v917_v61 = vpop.f32.mrf.mxu1  ;;  %v930_v62 = vpop.f32.mrf.mxu0 }
 0x97a   :  { %v935_v1 = vadd.f32 %v917_v61, %v2450_v9  ;;  %v936_v3 = vadd.f32 %v930_v62, %v2450_v9  ;;  %v934_v34 = vadd.f32 %v2468_v35, %v917_v61 }
 0x97c   :  { %1005 = vrot.lane.b32.xlu2 %v935_v1, %s2172_s15  ;;  %1052 = vrot.lane.b32.xlu0 %v936_v3, %s2171_s14 }
 0x97f   :  { %v810_v4 = vpop.permute.xlu1 %809 }
 0x980   :  { %1942 = vmatmul.msk.bf16.vlgmr.msrb.gmra.mxu3 %vm294_vm0, %v810_v4 }
 0x981   :  { %v919_v5 = vpop.f32.mrf.mxu1  ;;  %v932_v7 = vpop.f32.mrf.mxu0  ;;  %1265 = vmatpush.bf16.msrb.mxu3 %v2421_v60 }
 0x984   :  { %1029 = vrot.lane.b32.xlu2 %v936_v3, %s2172_s15 }
 0x985   :  { %1266 = vmatpush.bf16.msrb.mxu3 %v2434_v0 }
 0x9d6   :  { %v1006_v10 = vpop.permute.xlu2 %1005 }
 0x9d7   :  { %v1008_v11 = vadd.f32 %v1006_v10, %v1003_v8 }
 0x9d9   :  { %v1949_v12 = vmul.f32 -1.442695, %v1008_v11 }
 0x9db   :  { %2054 = vpow2.f32 %v1949_v12 }
 0x9de   :  { %v1030_v55 = vpop.permute.xlu2 %1029 }
 0x9df   :  { %v1032_v57 = vadd.f32 %v1030_v55, %v1003_v8 }
 0x9e1   :  { %v2055_v13 = vpop.eup %2054  ;;  %v1950_v59 = vmul.f32 -1.442695, %v1032_v57 }
 0x9e2   :  { %v1012_v14 = vadd.f32 1.0, %v2055_v13 }
 0x9e4   :  { %2056 = vrcp.f32 %v1012_v14  ;;  %v1024_v20 = vand.u32 2147483648, %v1012_v14  ;;  %v1022_v22 = vand.u32 2147483647, %v1012_v14  ;;  %vm1018_vm1 = vweird.f32 %v1012_v14 }
 0x9e6   :  { %v1025_v6 = vor.u32 1.1754944e-38, %v1024_v20  ;;  %vm1023_vm3 = vcmp.eq.f32.partialorder %v1022_v22, 8.507059e+37 }
 0x9ea   :  { %v2057_v15 = vpop.eup %2056 }
 0x9eb   :  { %v1014_v17 = vmul.f32 %v2057_v15, %v1012_v14  ;;  %vm1019_vm15 = vweird.f32 %v2057_v15 }
 0x9ec   :  { %vm1020_vm2 = vmor %vm1018_vm1, %vm1019_vm15 }
 0x9ed   :  { %v1015_v18 = vsub.f32 1.0, %v1014_v17 }
 0x9ee   :  { %v1053_v26 = vpop.permute.xlu0 %1052 }
 0x9ef   :  { %v1016_v21 = vmul.f32 %v2057_v15, %v1015_v18 }
 0x9f1   :  { %v1017_v23 = vadd.f32 %v2057_v15, %v1016_v21 }
 0x9f3   :  { %v1021_v25 = vsel %vm1020_vm2, %v2057_v15, %v1017_v23 }
 0x9f4   :  { %v1026_v27 = vsel %vm1023_vm3, %v1025_v6, %v1021_v25 }
 0x9f5   :  { %v1055_v28 = vmul.f32 %v1053_v26, %v1026_v27 }
 0x9f7   :  { %1057 = vrot.lane.b32.xlu1 %v1055_v28, %s2170_s4 }
 0xa03   :  { %v823_v30 = vpop.f32.mrf.mxu3 }
 0xa04   :  { %v824_v32 = vadd.f32 %v2460_v16, %v823_v30 }
 0xa06   :  { %958 = vrot.lane.b32.xlu1 %v824_v32, %s2170_s4  ;;  %v937_v36 = vadd.f32 %v934_v34, %v824_v32 }
 0xa08   :  { %v1947_v37 = vmul.f32 -1.442695, %v937_v36 }
 0xa0a   :  { %2058 = vpow2.f32 %v1947_v37 }
 0xa0b   :  { %v825_v33 = vpop.f32.mrf.mxu3 }
 0xa10   :  { %v2059_v38 = vpop.eup %2058 }
 0xa11   :  { %v941_v39 = vadd.f32 1.0, %v2059_v38 }
 0xa13   :  { %2060 = vrcp.f32 %v941_v39  ;;  %v953_v49 = vand.u32 2147483648, %v941_v39  ;;  %vm947_vm5 = vweird.f32 %v941_v39  ;;  %v951_v50 = vand.u32 2147483647, %v941_v39 }
 0xa15   :  { %v954_v52 = vor.u32 1.1754944e-38, %v953_v49  ;;  %vm952_vm7 = vcmp.eq.f32.partialorder %v951_v50, 8.507059e+37 }
 0xa19   :  { %v2061_v41 = vpop.eup %2060 }
 0xa1a   :  { %v943_v42 = vmul.f32 %v2061_v41, %v941_v39  ;;  %vm948_vm4 = vweird.f32 %v2061_v41 }
 0xa1b   :  { %vm949_vm6 = vmor %vm947_vm5, %vm948_vm4 }
 0xa1c   :  { %v944_v44 = vsub.f32 1.0, %v943_v42  ;;  %v1172_v42 = vld [vmem:[#allocation2 + $0x8] sm:$0x3] }
 0xa1e   :  { %v945_v45 = vmul.f32 %v2061_v41, %v944_v44 }
 0xa20   :  { %v946_v46 = vadd.f32 %v2061_v41, %v945_v45 }
 0xa22   :  { %v950_v51 = vsel %vm949_vm6, %v2061_v41, %v946_v46 }
 0xa23   :  { %v955_v53 = vsel %vm952_vm7, %v954_v52, %v950_v51 }
 0xa24   :  { %v974_v27 = vmul.f32 %v955_v53, %v2540_v58 }
 0xa69   :  { %v1058_v43 = vpop.permute.xlu1 %1057 }
 0xa6a   :  { %v1060_v40 = vadd.f32 %v1058_v43, %v1003_v8 }
 0xa6c   :  { %2062 = vtanh.f32 %v1060_v40 }
 0xa6d   :  { %2064 = vpow2.f32 %v1950_v59 }
 0xa72   :  { %v2063_v47 = vpop.eup %2062 }
 0xa73   :  { %1064 = vrot.lane.b32.xlu0 %v2063_v47, %s2171_s14  ;;  %v2065_v61 = vpop.eup %2064 }
 0xa74   :  { %v1036_v62 = vadd.f32 1.0, %v2065_v61 }
 0xa76   :  { %2066 = vrcp.f32 %v1036_v62  ;;  %v1048_v10 = vand.u32 2147483648, %v1036_v62  ;;  %vm1042_vm9 = vweird.f32 %v1036_v62  ;;  %v1046_v11 = vand.u32 2147483647, %v1036_v62 }
 0xa78   :  { %v959_v19 = vpop.permute.xlu1 %958  ;;  %v1049_v13 = vor.u32 1.1754944e-38, %v1048_v10  ;;  %vm1047_vm11 = vcmp.eq.f32.partialorder %v1046_v11, 8.507059e+37 }
 0xa79   :  { %v961_v54 = vmul.f32 %v959_v19, %v955_v53 }
 0xa7b   :  { %963 = vrot.lane.b32.xlu0 %v961_v54, %s2170_s4 }
 0xa7c   :  { %v2067_v1 = vpop.eup %2066 }
 0xa7d   :  { %v1038_v3 = vmul.f32 %v2067_v1, %v1036_v62  ;;  %vm1043_vm8 = vweird.f32 %v2067_v1 }
 0xa7e   :  { %vm1044_vm10 = vmor %vm1042_vm9, %vm1043_vm8 }
 0xa7f   :  { %v1039_v4 = vsub.f32 1.0, %v1038_v3 }
 0xa81   :  { %v1040_v5 = vmul.f32 %v2067_v1, %v1039_v4 }
 0xa83   :  { %v1041_v7 = vadd.f32 %v2067_v1, %v1040_v5 }
 0xa85   :  { %v1045_v12 = vsel %vm1044_vm10, %v2067_v1, %v1041_v7 }
 0xa86   :  { %v1050_v14 = vsel %vm1047_vm11, %v1049_v13, %v1045_v12 }
 0xa87   :  { %v1062_v8 = vsub.f32 1.0, %v1050_v14  ;;  %v1068_v18 = vmul.f32 %v1050_v14, %v2527_v48  ;;  %v968_v48 = vsub.f32 1.0, %v955_v53 }
 0xae5   :  { %v1065_v15 = vpop.permute.xlu0 %1064 }
 0xae6   :  { %v1067_v17 = vmul.f32 %v1065_v15, %v1062_v8 }
 0xae8   :  { %v2560_v20 = vadd.f32 %v1068_v18, %v1067_v17 }
 0xaea   :  { %v1070_v21 = vpack.c.bf16 %v2560_v20, %v2560_v20 }
 0xaec   :  { %1072 = vrot.lane.b32.xlu2 %v1070_v21, %s2171_s14 }
 0xaed   :  { %v964_v22 = vpop.permute.xlu0 %963 }
 0xaee   :  { %v966_v23 = vadd.f32 %v964_v22, %v934_v34 }
 0xaf0   :  { %2068 = vtanh.f32 %v966_v23 }
 0xaf6   :  { %v2069_v6 = vpop.eup %2068 }
 0xaf7   :  { %970 = vrot.lane.b32.xlu1 %v2069_v6, %s2171_s14 }
 0xb46   :  { %v1073_v25 = vpop.permute.xlu2 %1072 }
 0xb47   :  { %1951 = vmatmul.msk.bf16.vlgmr.msra.gmra.mxu3 %vm294_vm0, %v1073_v25  ;;  %1952 = vmatmul.msk.bf16.vlgmr.msra.gmra.mxu1 %vm294_vm0, %v1073_v25 }
 0xb48   :  { %1590 = vmatpush.bf16.msra.mxu1 %v2410_v56  ;;  %1496 = vmatpush.bf16.msra.mxu3 %v2484_v24 }
 0xb4c   :  { %1591 = vmatpush.bf16.msra.mxu1 %v2430_v63  ;;  %1497 = vmatpush.bf16.msra.mxu3 %v2500_v31 }
 0xb69   :  { %v971_v26 = vpop.permute.xlu1 %970 }
 0xb6a   :  { %v973_v28 = vmul.f32 %v971_v26, %v968_v48 }
 0xb6c   :  { %v2573_v30 = vadd.f32 %v974_v27, %v973_v28 }
 0xb6e   :  { %v976_v32 = vpack.c.bf16 %v2573_v30, %v2573_v30 }
 0xb70   :  { %978 = vrot.lane.b32.xlu2 %v976_v32, %s2171_s14 }
 0xbc4   :  { %v1099_v33 = vpop.f32.mrf.mxu1 }
 0xbc5   :  { %v1105_v34 = vadd.f32 %v1099_v33, %v2450_v9 }
 0xbc7   :  { %1221 = vrot.lane.b32.xlu1 %v1105_v34, %s2171_s14 }
 0xbca   :  { %v1086_v36 = vpop.f32.mrf.mxu3  ;;  %v979_v37 = vpop.permute.xlu2 %978 }
 0xbcb   :  { %v1104_v38 = vadd.f32 %v1086_v36, %v2450_v9  ;;  %1948 = vmatmul.msk.bf16.vlgmr.msrb.gmra.mxu2 %vm294_vm0, %v979_v37  ;;  %v1103_v4 = vadd.f32 %v2468_v35, %v1086_v36 }
 0xbcc   :  { %v1101_v39 = vpop.f32.mrf.mxu1  ;;  %1434 = vmatpush.bf16.msrb.mxu2 %v2421_v60 }
 0xbcd   :  { %1174 = vrot.lane.b32.xlu0 %v1104_v38, %s2172_s15 }
 0xbd0   :  { %1435 = vmatpush.bf16.msrb.mxu2 %v2434_v0 }
 0xbd2   :  { %v1088_v41 = vpop.f32.mrf.mxu3 }
 0xbd5   :  { %1198 = vrot.lane.b32.xlu0 %v1105_v34, %s2172_s15 }
 0xc39   :  { %v1222_v62 = vpop.permute.xlu1 %1221 }
 0xc3f   :  { %v1175_v43 = vpop.permute.xlu0 %1174 }
 0xc40   :  { %v1177_v44 = vadd.f32 %v1175_v43, %v1172_v42 }
 0xc42   :  { %v1955_v40 = vmul.f32 -1.442695, %v1177_v44 }
 0xc44   :  { %2070 = vpow2.f32 %v1955_v40 }
 0xc47   :  { %v1199_v28 = vpop.permute.xlu0 %1198 }
 0xc48   :  { %v1201_v32 = vadd.f32 %v1199_v28, %v1172_v42 }
 0xc4a   :  { %v2071_v45 = vpop.eup %2070  ;;  %v1956_v33 = vmul.f32 -1.442695, %v1201_v32 }
 0xc4b   :  { %v1181_v46 = vadd.f32 1.0, %v2071_v45 }
 0xc4d   :  { %2072 = vrcp.f32 %v1181_v46  ;;  %v1193_v19 = vand.u32 2147483648, %v1181_v46  ;;  %v1191_v55 = vand.u32 2147483647, %v1181_v46  ;;  %vm1187_vm13 = vweird.f32 %v1181_v46 }
 0xc4e   :  { %v992_v47 = vpop.f32.mrf.mxu2 }
 0xc4f   :  { %v993_v49 = vadd.f32 %v2460_v16, %v992_v47  ;;  %v1194_v59 = vor.u32 1.1754944e-38, %v1193_v19  ;;  %vm1192_vm15 = vcmp.eq.f32.partialorder %v1191_v55, 8.507059e+37 }
 0xc51   :  { %1127 = vrot.lane.b32.xlu1 %v993_v49, %s2170_s4  ;;  %v1106_v5 = vadd.f32 %v1103_v4, %v993_v49 }
 0xc53   :  { %v2073_v50 = vpop.eup %2072  ;;  %v1953_v7 = vmul.f32 -1.442695, %v1106_v5 }
 0xc54   :  { %v1183_v51 = vmul.f32 %v2073_v50, %v1181_v46  ;;  %vm1188_vm12 = vweird.f32 %v2073_v50 }
 0xc55   :  { %vm1189_vm14 = vmor %vm1187_vm13, %vm1188_vm12  ;;  %2074 = vpow2.f32 %v1953_v7 }
 0xc56   :  { %v994_v52 = vpop.f32.mrf.mxu2  ;;  %v1184_v53 = vsub.f32 1.0, %v1183_v51 }
 0xc58   :  { %v1185_v54 = vmul.f32 %v2073_v50, %v1184_v53 }
 0xc5a   :  { %v1186_v57 = vadd.f32 %v2073_v50, %v1185_v54 }
 0xc5b   :  { %v2075_v10 = vpop.eup %2074 }
 0xc5c   :  { %v1190_v61 = vsel %vm1189_vm14, %v2073_v50, %v1186_v57  ;;  %v1110_v11 = vadd.f32 1.0, %v2075_v10  ;;  %v1341_v10 = vld [vmem:[#allocation2 + $0xa] sm:$0x3] }
 0xc5d   :  { %v1195_v1 = vsel %vm1192_vm15, %v1194_v59, %v1190_v61 }
 0xc5e   :  { %v1224_v3 = vmul.f32 %v1222_v62, %v1195_v1  ;;  %2076 = vrcp.f32 %v1110_v11  ;;  %v1122_v21 = vand.u32 2147483648, %v1110_v11  ;;  %vm1116_vm2 = vweird.f32 %v1110_v11 }
 0xc5f   :  { %v1120_v22 = vand.u32 2147483647, %v1110_v11 }
 0xc60   :  { %1226 = vrot.lane.b32.xlu2 %v1224_v3, %s2170_s4  ;;  %v1123_v6 = vor.u32 1.1754944e-38, %v1122_v21 }
 0xc61   :  { %vm1121_vm4 = vcmp.eq.f32.partialorder %v1120_v22, 8.507059e+37 }
 0xc64   :  { %v2077_v12 = vpop.eup %2076 }
 0xc65   :  { %v1112_v13 = vmul.f32 %v2077_v12, %v1110_v11  ;;  %vm1117_vm1 = vweird.f32 %v2077_v12 }
 0xc66   :  { %vm1118_vm3 = vmor %vm1116_vm2, %vm1117_vm1 }
 0xc67   :  { %v1113_v14 = vsub.f32 1.0, %v1112_v13 }
 0xc69   :  { %v1114_v8 = vmul.f32 %v2077_v12, %v1113_v14 }
 0xc6b   :  { %v1115_v18 = vadd.f32 %v2077_v12, %v1114_v8 }
 0xc6d   :  { %v1119_v23 = vsel %vm1118_vm3, %v2077_v12, %v1115_v18 }
 0xc6e   :  { %v1124_v26 = vsel %vm1121_vm4, %v1123_v6, %v1119_v23 }
 0xc6f   :  { %v1143_v61 = vmul.f32 %v1124_v26, %v2573_v30 }
 0xcba   :  { %v1227_v15 = vpop.permute.xlu2 %1226 }
 0xcbb   :  { %v1229_v17 = vadd.f32 %v1227_v15, %v1172_v42 }
 0xcbd   :  { %2078 = vtanh.f32 %v1229_v17 }
 0xcbe   :  { %2080 = vpow2.f32 %v1956_v33 }
 0xcc3   :  { %v2079_v25 = vpop.eup %2078  ;;  %v1128_v48 = vpop.permute.xlu1 %1127 }
 0xcc4   :  { %v1130_v27 = vmul.f32 %v1128_v48, %v1124_v26  ;;  %1233 = vrot.lane.b32.xlu2 %v2079_v25, %s2171_s14  ;;  %v2081_v34 = vpop.eup %2080 }
 0xcc5   :  { %v1205_v36 = vadd.f32 1.0, %v2081_v34 }
 0xcc6   :  { %1132 = vrot.lane.b32.xlu0 %v1130_v27, %s2170_s4 }
 0xcc7   :  { %2082 = vrcp.f32 %v1205_v36  ;;  %v1217_v44 = vand.u32 2147483648, %v1205_v36  ;;  %vm1211_vm6 = vweird.f32 %v1205_v36  ;;  %v1215_v40 = vand.u32 2147483647, %v1205_v36 }
 0xcc9   :  { %v1218_v46 = vor.u32 1.1754944e-38, %v1217_v44  ;;  %vm1216_vm8 = vcmp.eq.f32.partialorder %v1215_v40, 8.507059e+37 }
 0xccd   :  { %v2083_v37 = vpop.eup %2082 }
 0xcce   :  { %v1207_v38 = vmul.f32 %v2083_v37, %v1205_v36  ;;  %vm1212_vm5 = vweird.f32 %v2083_v37 }
 0xccf   :  { %vm1213_vm7 = vmor %vm1211_vm6, %vm1212_vm5 }
 0xcd0   :  { %v1208_v39 = vsub.f32 1.0, %v1207_v38 }
 0xcd2   :  { %v1209_v41 = vmul.f32 %v2083_v37, %v1208_v39 }
 0xcd4   :  { %v1210_v43 = vadd.f32 %v2083_v37, %v1209_v41 }
 0xcd6   :  { %v1214_v45 = vsel %vm1213_vm7, %v2083_v37, %v1210_v43 }
 0xcd7   :  { %v1219_v47 = vsel %vm1216_vm8, %v1218_v46, %v1214_v45 }
 0xcd8   :  { %v1231_v42 = vsub.f32 1.0, %v1219_v47  ;;  %v1237_v50 = vmul.f32 %v1219_v47, %v2560_v20  ;;  %v1137_v20 = vsub.f32 1.0, %v1124_v26 }
 0xd1e   :  { %v1234_v49 = vpop.permute.xlu2 %1233 }
 0xd1f   :  { %v1236_v51 = vmul.f32 %v1234_v49, %v1231_v42 }
 0xd21   :  { %v2593_v52 = vadd.f32 %v1237_v50, %v1236_v51 }
 0xd23   :  { %v1239_v53 = vpack.c.bf16 %v2593_v52, %v2593_v52 }
 0xd25   :  { %1241 = vrot.lane.b32.xlu1 %v1239_v53, %s2171_s14 }
 0xd38   :  { %v1133_v19 = vpop.permute.xlu0 %1132 }
 0xd39   :  { %v1135_v54 = vadd.f32 %v1133_v19, %v1103_v4 }
 0xd3b   :  { %2084 = vtanh.f32 %v1135_v54 }
 0xd41   :  { %v2085_v55 = vpop.eup %2084 }
 0xd42   :  { %1139 = vrot.lane.b32.xlu2 %v2085_v55, %s2171_s14 }
 0xd97   :  { %v1242_v57 = vpop.permute.xlu1 %1241 }
 0xd98   :  { %1957 = vmatmul.msk.bf16.vlgmr.msra.gmra.mxu2 %vm294_vm0, %v1242_v57  ;;  %1958 = vmatmul.msk.bf16.vlgmr.msrb.gmra.mxu3 %vm294_vm0, %v1242_v57 }
 0xd99   :  { %1759 = vmatpush.bf16.msrb.mxu3 %v2410_v56  ;;  %1665 = vmatpush.bf16.msra.mxu2 %v2484_v24 }
 0xd9c   :  { %v1140_v59 = vpop.permute.xlu2 %1139 }
 0xd9d   :  { %v1142_v62 = vmul.f32 %v1140_v59, %v1137_v20  ;;  %1760 = vmatpush.bf16.msrb.mxu3 %v2430_v63  ;;  %1666 = vmatpush.bf16.msra.mxu2 %v2500_v31 }
 0xd9f   :  { %v2606_v1 = vadd.f32 %v1143_v61, %v1142_v62 }
 0xda1   :  { %v1145_v3 = vpack.c.bf16 %v2606_v1, %v2606_v1 }
 0xda3   :  { %1147 = vrot.lane.b32.xlu0 %v1145_v3, %s2171_s14 }
 0xe15   :  { %v1148_v4 = vpop.permute.xlu0 %1147 }
 0xe16   :  { %1954 = vmatmul.msk.bf16.vlgmr.msrb.gmra.mxu0 %vm294_vm0, %v1148_v4 }
 0xe17   :  { %1603 = vmatpush.bf16.msrb.mxu0 %v2421_v60 }
 0xe1b   :  { %v1255_v56 = vpop.f32.mrf.mxu2  ;;  %v1268_v24 = vpop.f32.mrf.mxu3  ;;  %1604 = vmatpush.bf16.msrb.mxu0 %v2434_v0 }
 0xe1c   :  { %v1273_v63 = vadd.f32 %v1255_v56, %v2450_v9  ;;  %v1274_v31 = vadd.f32 %v1268_v24, %v2450_v9  ;;  %v1272_v32 = vadd.f32 %v2468_v35, %v1255_v56 }
 0xe1e   :  { %1390 = vrot.lane.b32.xlu2 %v1274_v31, %s2171_s14  ;;  %1343 = vrot.lane.b32.xlu1 %v1273_v63, %s2172_s15 }
 0xe23   :  { %v1257_v5 = vpop.f32.mrf.mxu2  ;;  %v1270_v7 = vpop.f32.mrf.mxu3 }
 0xe26   :  { %1367 = vrot.lane.b32.xlu2 %v1274_v31, %s2172_s15 }
 0xe90   :  { %v1344_v11 = vpop.permute.xlu1 %1343 }
 0xe91   :  { %v1346_v12 = vadd.f32 %v1344_v11, %v1341_v10 }
 0xe93   :  { %v1961_v60 = vmul.f32 -1.442695, %v1346_v12  ;;  %v1161_v13 = vpop.f32.mrf.mxu0 }
 0xe94   :  { %v1162_v14 = vadd.f32 %v2460_v16, %v1161_v13  ;;  %v1391_v16 = vpop.permute.xlu2 %1390 }
 0xe95   :  { %2086 = vpow2.f32 %v1961_v60 }
 0xe96   :  { %1296 = vrot.lane.b32.xlu1 %v1162_v14, %s2170_s4  ;;  %v1275_v33 = vadd.f32 %v1272_v32, %v1162_v14 }
 0xe98   :  { %v1959_v34 = vmul.f32 -1.442695, %v1275_v33  ;;  %v2648_v33 = vld [vmem:[%s2757_s19] ss:$0 sm:$0xff] }
 0xe9b   :  { %v2087_v0 = vpop.eup %2086  ;;  %v1163_v8 = vpop.f32.mrf.mxu0 }
 0xe9c   :  { %v1350_v15 = vadd.f32 1.0, %v2087_v0  ;;  %v1368_v19 = vpop.permute.xlu2 %1367 }
 0xe9d   :  { %v1370_v54 = vadd.f32 %v1368_v19, %v1341_v10 }
 0xe9e   :  { %2088 = vrcp.f32 %v1350_v15  ;;  %v1362_v22 = vand.u32 2147483648, %v1350_v15  ;;  %v1360_v6 = vand.u32 2147483647, %v1350_v15  ;;  %vm1356_vm10 = vweird.f32 %v1350_v15 }
 0xe9f   :  { %2090 = vpow2.f32 %v1959_v34  ;;  %v1962_v55 = vmul.f32 -1.442695, %v1370_v54 }
 0xea0   :  { %v1363_v48 = vor.u32 1.1754944e-38, %v1362_v22  ;;  %vm1361_vm12 = vcmp.eq.f32.partialorder %v1360_v6, 8.507059e+37 }
 0xea4   :  { %v2089_v17 = vpop.eup %2088 }
 0xea5   :  { %v1352_v18 = vmul.f32 %v2089_v17, %v1350_v15  ;;  %vm1357_vm9 = vweird.f32 %v2089_v17  ;;  %v2091_v36 = vpop.eup %2090 }
 0xea6   :  { %vm1358_vm11 = vmor %vm1356_vm10, %vm1357_vm9  ;;  %v1279_v37 = vadd.f32 1.0, %v2091_v36 }
 0xea7   :  { %v1353_v21 = vsub.f32 1.0, %v1352_v18 }
 0xea8   :  { %2092 = vrcp.f32 %v1279_v37  ;;  %v1291_v40 = vand.u32 2147483648, %v1279_v37  ;;  %vm1285_vm14 = vweird.f32 %v1279_v37  ;;  %v1289_v45 = vand.u32 2147483647, %v1279_v37 }
 0xea9   :  { %v1354_v23 = vmul.f32 %v2089_v17, %v1353_v21 }
 0xeaa   :  { %v1292_v47 = vor.u32 1.1754944e-38, %v1291_v40  ;;  %vm1290_vm1 = vcmp.eq.f32.partialorder %v1289_v45, 8.507059e+37 }
 0xeab   :  { %v1355_v25 = vadd.f32 %v2089_v17, %v1354_v23 }
 0xead   :  { %v1359_v26 = vsel %vm1358_vm11, %v2089_v17, %v1355_v25 }
 0xeae   :  { %v1364_v27 = vsel %vm1361_vm12, %v1363_v48, %v1359_v26  ;;  %v2093_v38 = vpop.eup %2092 }
 0xeaf   :  { %v1393_v28 = vmul.f32 %v1391_v16, %v1364_v27  ;;  %v1281_v39 = vmul.f32 %v2093_v38, %v1279_v37  ;;  %vm1286_vm13 = vweird.f32 %v2093_v38  ;;  %v1510_v37 = vld [vmem:[#allocation2 + $0xc] sm:$0x3] }
 0xeb0   :  { %vm1287_vm15 = vmor %vm1285_vm14, %vm1286_vm13 }
 0xeb1   :  { %1395 = vrot.lane.b32.xlu0 %v1393_v28, %s2170_s4  ;;  %v1282_v41 = vsub.f32 1.0, %v1281_v39 }
 0xeb3   :  { %v1283_v43 = vmul.f32 %v2093_v38, %v1282_v41 }
 0xeb5   :  { %v1284_v44 = vadd.f32 %v2093_v38, %v1283_v43 }
 0xeb7   :  { %v1288_v46 = vsel %vm1287_vm15, %v2093_v38, %v1284_v44 }
 0xeb8   :  { %v1293_v42 = vsel %vm1290_vm1, %v1292_v47, %v1288_v46 }
 0xeb9   :  { %v1306_v15 = vsub.f32 1.0, %v1293_v42  ;;  %v1312_v18 = vmul.f32 %v1293_v42, %v2606_v1 }
 0xf08   :  { %v1297_v35 = vpop.permute.xlu1 %1296 }
 0xf09   :  { %v1299_v49 = vmul.f32 %v1297_v35, %v1293_v42 }
 0xf0b   :  { %1301 = vrot.lane.b32.xlu0 %v1299_v49, %s2170_s4 }
 0xf23   :  { %v1396_v50 = vpop.permute.xlu0 %1395 }
 0xf24   :  { %v1398_v51 = vadd.f32 %v1396_v50, %v1341_v10 }
 0xf26   :  { %2094 = vtanh.f32 %v1398_v51 }
 0xf27   :  { %2096 = vpow2.f32 %v1962_v55  ;;  %v2657_v55 = vld [vmem:[%s2755_s17] ss:$0 sm:$0xff] }
 0xf2c   :  { %v2095_v53 = vpop.eup %2094 }
 0xf2d   :  { %1402 = vrot.lane.b32.xlu1 %v2095_v53, %s2171_s14  ;;  %v2097_v57 = vpop.eup %2096 }
 0xf2e   :  { %v1374_v20 = vadd.f32 1.0, %v2097_v57 }
 0xf30   :  { %2098 = vrcp.f32 %v1374_v20  ;;  %v1386_v31 = vand.u32 2147483648, %v1374_v20  ;;  %vm1380_vm3 = vweird.f32 %v1374_v20  ;;  %v1384_v5 = vand.u32 2147483647, %v1374_v20 }
 0xf32   :  { %v1387_v10 = vor.u32 1.1754944e-38, %v1386_v31  ;;  %vm1385_vm5 = vcmp.eq.f32.partialorder %v1384_v5, 8.507059e+37 }
 0xf36   :  { %v2099_v62 = vpop.eup %2098 }
 0xf37   :  { %v1376_v4 = vmul.f32 %v2099_v62, %v1374_v20  ;;  %vm1381_vm2 = vweird.f32 %v2099_v62 }
 0xf38   :  { %vm1382_vm4 = vmor %vm1380_vm3, %vm1381_vm2 }
 0xf39   :  { %v1377_v56 = vsub.f32 1.0, %v1376_v4 }
 0xf3b   :  { %v1378_v24 = vmul.f32 %v2099_v62, %v1377_v56 }
 0xf3d   :  { %v1379_v63 = vadd.f32 %v2099_v62, %v1378_v24 }
 0xf3f   :  { %v1383_v7 = vsel %vm1382_vm4, %v2099_v62, %v1379_v63 }
 0xf40   :  { %v1388_v11 = vsel %vm1385_vm5, %v1387_v10, %v1383_v7 }
 0xf41   :  { %v1400_v12 = vsub.f32 1.0, %v1388_v11  ;;  %v1406_v14 = vmul.f32 %v1388_v11, %v2593_v52 }
 0xf7d   :  { %v1302_v59 = vpop.permute.xlu0 %1301 }
 0xf7e   :  { %v1304_v61 = vadd.f32 %v1302_v59, %v1272_v32 }
 0xf80   :  { %2100 = vtanh.f32 %v1304_v61 }
 0xf86   :  { %v2101_v3 = vpop.eup %2100 }
 0xf87   :  { %1308 = vrot.lane.b32.xlu2 %v2101_v3, %s2171_s14 }
 0xf9f   :  { %v1403_v60 = vpop.permute.xlu1 %1402 }
 0xfa0   :  { %v1405_v13 = vmul.f32 %v1403_v60, %v1400_v12 }
 0xfa2   :  { %v2627_v0 = vadd.f32 %v1406_v14, %v1405_v13 }
 0xfa4   :  { %v1408_v8 = vpack.c.bf16 %v2627_v0, %v2627_v0 }
 0xfa6   :  { %1410 = vrot.lane.b32.xlu0 %v1408_v8, %s2171_s14 }
 0xfe1   :  { %v1309_v17 = vpop.permute.xlu2 %1308 }
 0xfe2   :  { %v1311_v21 = vmul.f32 %v1309_v17, %v1306_v15 }
 0xfe4   :  { %v2633_v22 = vadd.f32 %v1312_v18, %v1311_v21 }
 0xfe6   :  { %v1314_v23 = vpack.c.bf16 %v2633_v22, %v2633_v22 }
 0xfe8   :  { %1316 = vrot.lane.b32.xlu1 %v1314_v23, %s2171_s14 }
0x1018   :  { %v1411_v52 = vpop.permute.xlu0 %1410 }
0x1019   :  { %1963 = vmatmul.msk.bf16.vlgmr.msra.gmra.mxu0 %vm294_vm0, %v1411_v52  ;;  %1964 = vmatmul.msk.bf16.vlgmr.msrb.gmra.mxu2 %vm294_vm0, %v1411_v52 }
0x105a   :  { %v1317_v6 = vpop.permute.xlu1 %1316 }
0x105b   :  { %1960 = vmatmul.msk.bf16.vlgmr.msrb.gmra.mxu1 %vm294_vm0, %v1317_v6 }
0x1096   :  { %v1424_v25 = vpop.f32.mrf.mxu0 }
0x1097   :  { %v1442_v48 = vadd.f32 %v1424_v25, %v2450_v9  ;;  %v1441_v57 = vadd.f32 %v2657_v55, %v1424_v25 }
0x1099   :  { %1512 = vrot.lane.b32.xlu2 %v1442_v48, %s2172_s15 }
0x109c   :  { %v1437_v26 = vpop.f32.mrf.mxu2 }
0x109d   :  { %v1443_v16 = vadd.f32 %v1437_v26, %v2450_v9 }
0x109e   :  { %v1426_v27 = vpop.f32.mrf.mxu0 }
0x109f   :  { %1559 = vrot.lane.b32.xlu0 %v1443_v16, %s2171_s14 }
0x10a4   :  { %v1439_v28 = vpop.f32.mrf.mxu2 }
0x10d8   :  { %v1330_v32 = vpop.f32.mrf.mxu1 }
0x10d9   :  { %v1331_v34 = vadd.f32 %v2648_v33, %v1330_v32 }
0x10db   :  { %1465 = vrot.lane.b32.xlu1 %v1331_v34, %s2170_s4  ;;  %v1444_v20 = vadd.f32 %v1441_v57, %v1331_v34 }
0x10dd   :  { %v1965_v59 = vmul.f32 -1.442695, %v1444_v20 }
0x10e0   :  { %v1332_v36 = vpop.f32.mrf.mxu1 }
0x10e3   :  { %1536 = vrot.lane.b32.xlu1 %v1443_v16, %s2172_s15 }
0x10f3   :  { %v1513_v38 = vpop.permute.xlu2 %1512 }
0x10f4   :  { %v1515_v39 = vadd.f32 %v1513_v38, %v1510_v37 }
0x10f6   :  { %v1967_v41 = vmul.f32 -1.442695, %v1515_v39 }
0x10f8   :  { %2102 = vpow2.f32 %v1967_v41 }
0x10fe   :  { %v2103_v43 = vpop.eup %2102 }
0x10ff   :  { %v1519_v44 = vadd.f32 1.0, %v2103_v43 }
0x1101   :  { %2104 = vrcp.f32 %v1519_v44  ;;  %v1531_v47 = vand.u32 2147483648, %v1519_v44  ;;  %v1529_v42 = vand.u32 2147483647, %v1519_v44  ;;  %vm1525_vm7 = vweird.f32 %v1519_v44 }
0x1102   :  { %2106 = vpow2.f32 %v1965_v59 }
0x1103   :  { %v1532_v50 = vor.u32 1.1754944e-38, %v1531_v47  ;;  %vm1530_vm9 = vcmp.eq.f32.partialorder %v1529_v42, 8.507059e+37 }
0x1107   :  { %v2105_v40 = vpop.eup %2104 }
0x1108   :  { %v1521_v45 = vmul.f32 %v2105_v40, %v1519_v44  ;;  %vm1526_vm6 = vweird.f32 %v2105_v40  ;;  %v2107_v61 = vpop.eup %2106 }
0x1109   :  { %vm1527_vm8 = vmor %vm1525_vm7, %vm1526_vm6  ;;  %v1448_v62 = vadd.f32 1.0, %v2107_v61 }
0x110a   :  { %v1522_v46 = vsub.f32 1.0, %v1521_v45 }
0x110b   :  { %2108 = vrcp.f32 %v1448_v62  ;;  %v1460_v31 = vand.u32 2147483648, %v1448_v62  ;;  %vm1454_vm11 = vweird.f32 %v1448_v62  ;;  %v1458_v5 = vand.u32 2147483647, %v1448_v62 }
0x110c   :  { %v1523_v35 = vmul.f32 %v2105_v40, %v1522_v46 }
0x110d   :  { %v1461_v10 = vor.u32 1.1754944e-38, %v1460_v31  ;;  %vm1459_vm13 = vcmp.eq.f32.partialorder %v1458_v5, 8.507059e+37 }
0x110e   :  { %v1524_v49 = vadd.f32 %v2105_v40, %v1523_v35 }
0x1110   :  { %v1528_v51 = vsel %vm1527_vm8, %v2105_v40, %v1524_v49 }
0x1111   :  { %v1560_v53 = vpop.permute.xlu0 %1559  ;;  %v1533_v19 = vsel %vm1530_vm9, %v1532_v50, %v1528_v51  ;;  %v2109_v3 = vpop.eup %2108 }
0x1112   :  { %v1562_v54 = vmul.f32 %v1560_v53, %v1533_v19  ;;  %v1450_v4 = vmul.f32 %v2109_v3, %v1448_v62  ;;  %vm1455_vm10 = vweird.f32 %v2109_v3 }
0x1113   :  { %vm1456_vm12 = vmor %vm1454_vm11, %vm1455_vm10 }
0x1114   :  { %1564 = vrot.lane.b32.xlu2 %v1562_v54, %s2170_s4  ;;  %v1451_v56 = vsub.f32 1.0, %v1450_v4  ;;  %v1679_v4 = vld [vmem:[#allocation2 + $0xe] sm:$0x3] }
0x1116   :  { %v1452_v24 = vmul.f32 %v2109_v3, %v1451_v56 }
0x1118   :  { %v1453_v63 = vadd.f32 %v2109_v3, %v1452_v24 }
0x111a   :  { %v1457_v7 = vsel %vm1456_vm12, %v2109_v3, %v1453_v63 }
0x111b   :  { %v1462_v12 = vsel %vm1459_vm13, %v1461_v10, %v1457_v7 }
0x111c   :  { %v1475_v46 = vsub.f32 1.0, %v1462_v12  ;;  %v1481_v35 = vmul.f32 %v1462_v12, %v2633_v22 }
0x114d   :  { %v1466_v11 = vpop.permute.xlu1 %1465 }
0x114e   :  { %v1468_v60 = vmul.f32 %v1466_v11, %v1462_v12 }
0x1150   :  { %1470 = vrot.lane.b32.xlu0 %v1468_v60, %s2170_s4 }
0x1155   :  { %v1537_v15 = vpop.permute.xlu1 %1536 }
0x1156   :  { %v1539_v17 = vadd.f32 %v1537_v15, %v1510_v37 }
0x1158   :  { %v1968_v18 = vmul.f32 -1.442695, %v1539_v17 }
0x116e   :  { %v1565_v13 = vpop.permute.xlu2 %1564 }
0x116f   :  { %v1567_v14 = vadd.f32 %v1565_v13, %v1510_v37 }
0x1171   :  { %2110 = vtanh.f32 %v1567_v14 }
0x1172   :  { %2112 = vpow2.f32 %v1968_v18 }
0x1177   :  { %v2111_v8 = vpop.eup %2110 }
0x1178   :  { %1571 = vrot.lane.b32.xlu2 %v2111_v8, %s2171_s14  ;;  %v2113_v21 = vpop.eup %2112 }
0x1179   :  { %v1543_v23 = vadd.f32 1.0, %v2113_v21 }
0x117b   :  { %2114 = vrcp.f32 %v1543_v23  ;;  %v1555_v28 = vand.u32 2147483648, %v1543_v23  ;;  %vm1549_vm15 = vweird.f32 %v1543_v23  ;;  %v1553_v32 = vand.u32 2147483647, %v1543_v23 }
0x117d   :  { %v1556_v37 = vor.u32 1.1754944e-38, %v1555_v28  ;;  %vm1554_vm2 = vcmp.eq.f32.partialorder %v1553_v32, 8.507059e+37 }
0x1181   :  { %v2115_v52 = vpop.eup %2114 }
0x1182   :  { %v1545_v6 = vmul.f32 %v2115_v52, %v1543_v23  ;;  %vm1550_vm14 = vweird.f32 %v2115_v52 }
0x1183   :  { %vm1551_vm1 = vmor %vm1549_vm15, %vm1550_vm14 }
0x1184   :  { %v1546_v25 = vsub.f32 1.0, %v1545_v6 }
0x1186   :  { %v1547_v16 = vmul.f32 %v2115_v52, %v1546_v25 }
0x1188   :  { %v1548_v27 = vadd.f32 %v2115_v52, %v1547_v16 }
0x118a   :  { %v1552_v36 = vsel %vm1551_vm1, %v2115_v52, %v1548_v27 }
0x118b   :  { %v1557_v38 = vsel %vm1554_vm2, %v1556_v37, %v1552_v36 }
0x118c   :  { %v1569_v39 = vsub.f32 1.0, %v1557_v38  ;;  %v1575_v43 = vmul.f32 %v1557_v38, %v2627_v0 }
0x11c2   :  { %v1471_v48 = vpop.permute.xlu0 %1470 }
0x11c3   :  { %v1473_v26 = vadd.f32 %v1471_v48, %v1441_v57 }
0x11c5   :  { %2116 = vtanh.f32 %v1473_v26 }
0x11cb   :  { %v2117_v34 = vpop.eup %2116 }
0x11cc   :  { %1477 = vrot.lane.b32.xlu0 %v2117_v34, %s2171_s14 }
0x11d2   :  { %v1572_v41 = vpop.permute.xlu2 %1571 }
0x11d3   :  { %v1574_v44 = vmul.f32 %v1572_v41, %v1569_v39 }
0x11d5   :  { %v2664_v40 = vadd.f32 %v1575_v43, %v1574_v44 }
0x11d7   :  { %v1577_v45 = vpack.c.bf16 %v2664_v40, %v2664_v40 }
0x11d9   :  { %1579 = vrot.lane.b32.xlu1 %v1577_v45, %s2171_s14 }
0x123e   :  { %v1478_v47 = vpop.permute.xlu0 %1477 }
0x123f   :  { %v1480_v42 = vmul.f32 %v1478_v47, %v1475_v46 }
0x1241   :  { %v2670_v49 = vadd.f32 %v1481_v35, %v1480_v42 }
0x1243   :  { %v1483_v50 = vpack.c.bf16 %v2670_v49, %v2670_v49 }
0x1245   :  { %1485 = vrot.lane.b32.xlu2 %v1483_v50, %s2171_s14 }
0x124b   :  { %v1580_v0 = vpop.permute.xlu1 %1579 }
0x124c   :  { %1969 = vmatmul.msk.bf16.vlgmr.msra.gmra.mxu1 %vm294_vm0, %v1580_v0  ;;  %1970 = vmatmul.msk.bf16.vlgmr.msrb.gmra.mxu0 %vm294_vm0, %v1580_v0 }
0x129f   :  { %v1486_v51 = vpop.permute.xlu2 %1485 }
0x12a0   :  { %1966 = vmatmul.msk.bf16.vlgmr.msra.gmra.mxu3 %vm294_vm0, %v1486_v51 }
0x12c9   :  { %v1593_v53 = vpop.f32.mrf.mxu1  ;;  %v1606_v19 = vpop.f32.mrf.mxu0 }
0x12ca   :  { %v1611_v54 = vadd.f32 %v1593_v53, %v2450_v9  ;;  %v1612_v57 = vadd.f32 %v1606_v19, %v2450_v9  ;;  %v1610_v21 = vadd.f32 %v2657_v55, %v1593_v53 }
0x12cc   :  { %1728 = vrot.lane.b32.xlu2 %v1612_v57, %s2171_s14  ;;  %1681 = vrot.lane.b32.xlu0 %v1611_v54, %s2172_s15 }
0x12d1   :  { %v1595_v20 = vpop.f32.mrf.mxu1  ;;  %v1608_v59 = vpop.f32.mrf.mxu0 }
0x12d4   :  { %1705 = vrot.lane.b32.xlu2 %v1612_v57, %s2172_s15 }
0x1323   :  { %v1499_v61 = vpop.f32.mrf.mxu3 }
0x1324   :  { %v1500_v62 = vadd.f32 %v2648_v33, %v1499_v61 }
0x1326   :  { %1634 = vrot.lane.b32.xlu1 %v1500_v62, %s2170_s4  ;;  %v1729_v15 = vpop.permute.xlu2 %1728  ;;  %v1613_v23 = vadd.f32 %v1610_v21, %v1500_v62 }
0x1328   :  { %v1971_v52 = vmul.f32 -1.442695, %v1613_v23 }
0x132b   :  { %v1501_v3 = vpop.f32.mrf.mxu3 }
0x132e   :  { %v1706_v35 = vpop.permute.xlu2 %1705 }
0x132f   :  { %v1708_v50 = vadd.f32 %v1706_v35, %v1679_v4 }
0x1331   :  { %v1974_v0 = vmul.f32 -1.442695, %v1708_v50 }
0x133e   :  { %v1682_v56 = vpop.permute.xlu0 %1681 }
0x133f   :  { %v1684_v24 = vadd.f32 %v1682_v56, %v1679_v4 }
0x1341   :  { %v1973_v63 = vmul.f32 -1.442695, %v1684_v24 }
0x1343   :  { %2118 = vpow2.f32 %v1973_v63 }
0x1349   :  { %v2119_v9 = vpop.eup %2118 }
0x134a   :  { %v1688_v31 = vadd.f32 1.0, %v2119_v9 }
0x134c   :  { %2120 = vrcp.f32 %v1688_v31  ;;  %v1700_v11 = vand.u32 2147483648, %v1688_v31  ;;  %v1698_v60 = vand.u32 2147483647, %v1688_v31  ;;  %vm1694_vm4 = vweird.f32 %v1688_v31 }
0x134d   :  { %2122 = vpow2.f32 %v1971_v52 }
0x134e   :  { %v1701_v14 = vor.u32 1.1754944e-38, %v1700_v11  ;;  %vm1699_vm6 = vcmp.eq.f32.partialorder %v1698_v60, 8.507059e+37 }
0x1352   :  { %v2121_v5 = vpop.eup %2120 }
0x1353   :  { %v1690_v7 = vmul.f32 %v2121_v5, %v1688_v31  ;;  %vm1695_vm3 = vweird.f32 %v2121_v5  ;;  %v2123_v6 = vpop.eup %2122 }
0x1354   :  { %vm1696_vm5 = vmor %vm1694_vm4, %vm1695_vm3  ;;  %v1617_v25 = vadd.f32 1.0, %v2123_v6 }
0x1355   :  { %v1691_v10 = vsub.f32 1.0, %v1690_v7 }
0x1356   :  { %2124 = vrcp.f32 %v1617_v25  ;;  %v1629_v32 = vand.u32 2147483648, %v1617_v25  ;;  %vm1623_vm8 = vweird.f32 %v1617_v25  ;;  %v1627_v34 = vand.u32 2147483647, %v1617_v25 }
0x1357   :  { %v1692_v12 = vmul.f32 %v2121_v5, %v1691_v10 }
0x1358   :  { %v1630_v37 = vor.u32 1.1754944e-38, %v1629_v32  ;;  %vm1628_vm10 = vcmp.eq.f32.partialorder %v1627_v34, 8.507059e+37 }
0x1359   :  { %v1693_v13 = vadd.f32 %v2121_v5, %v1692_v12 }
0x135b   :  { %v1697_v8 = vsel %vm1696_vm5, %v2121_v5, %v1693_v13  ;;  %v479_v5 = vld [vmem:[%s2776_s23] sm:$0x3] }
0x135c   :  { %v1702_v17 = vsel %vm1699_vm6, %v1701_v14, %v1697_v8  ;;  %v2125_v48 = vpop.eup %2124  ;;  %v2694_v11 = vadd.s32 4294967294, %v479_v5 }
0x135d   :  { %v1731_v18 = vmul.f32 %v1729_v15, %v1702_v17  ;;  %v1619_v26 = vmul.f32 %v2125_v48, %v1617_v25  ;;  %vm1624_vm7 = vweird.f32 %v2125_v48 }
0x135e   :  { %vm1625_vm9 = vmor %vm1623_vm8, %vm1624_vm7  ;;  %vm658_vm15 = vcmp.eq.s32.totalorder %v2694_v11, 0  ;;  %vm1165_vm1 = vcmp.eq.s32.totalorder %v2694_v11, 3  ;;  %vm1503_vm2 = vcmp.eq.s32.totalorder %v2694_v11, 5  ;;  %vm827_vm3 = vcmp.eq.s32.totalorder %v2694_v11, 1 }
0x135f   :  { %1733 = vrot.lane.b32.xlu1 %v1731_v18, %s2170_s4  ;;  %v1620_v16 = vsub.f32 1.0, %v1619_v26  ;;  %v659_v12 = vsel %vm658_vm15, 1, %v2168_v2  ;;  %v1166_v60 = vsel %vm1165_vm1, 1, %v2168_v2  ;;  %vm1334_vm4 = vcmp.eq.s32.totalorder %v2694_v11, 4 }
0x1361   :  { %v1621_v27 = vmul.f32 %v2125_v48, %v1620_v16  ;;  %v828_v16 = vsel %vm827_vm3, 1, %v2168_v2 }
0x1363   :  { %v1622_v28 = vadd.f32 %v2125_v48, %v1621_v27  ;;  %v1335_v27 = vsel %vm1334_vm4, 1, %v2168_v2  ;;  %vm1817_vm4 = vcmask 254976  }
0x1365   :  { %v1626_v36 = vsel %vm1625_vm9, %v2125_v48, %v1622_v28  ;;  %vm996_vm9 = vcmp.eq.s32.totalorder %v2694_v11, 2 }
0x1366   :  { %v1631_v39 = vsel %vm1628_vm10, %v1630_v37, %v1626_v36  ;;  %vm1806_vm10 = vcmp.eq.s32.totalorder %v2694_v11, 7 }
0x1367   :  { %v1644_v13 = vsub.f32 1.0, %v1631_v39  ;;  %v1650_v8 = vmul.f32 %v1631_v39, %v2670_v49 }
0x1398   :  { %v1635_v38 = vpop.permute.xlu1 %1634 }
0x1399   :  { %v1637_v41 = vmul.f32 %v1635_v38, %v1631_v39 }
0x139b   :  { %1639 = vrot.lane.b32.xlu0 %v1637_v41, %s2170_s4 }
0x13d1   :  { %v1734_v43 = vpop.permute.xlu1 %1733 }
0x13d2   :  { %v1736_v44 = vadd.f32 %v1734_v43, %v1679_v4 }
0x13d4   :  { %2126 = vtanh.f32 %v1736_v44 }
0x13da   :  { %v2127_v45 = vpop.eup %2126 }
0x13db   :  { %1740 = vrot.lane.b32.xlu1 %v2127_v45, %s2171_s14 }
0x140d   :  { %v1640_v46 = vpop.permute.xlu0 %1639 }
0x140e   :  { %v1642_v47 = vadd.f32 %v1640_v46, %v1610_v21 }
0x1410   :  { %2128 = vtanh.f32 %v1642_v47 }
0x1411   :  { %2130 = vpow2.f32 %v1974_v0  ;;  %v997_v0 = vsel %vm996_vm9, 1, %v2168_v2 }
0x1416   :  { %v2129_v42 = vpop.eup %2128 }
0x1417   :  { %1646 = vrot.lane.b32.xlu0 %v2129_v42, %s2171_s14  ;;  %v2131_v51 = vpop.eup %2130 }
0x1418   :  { %v1712_v53 = vadd.f32 1.0, %v2131_v51 }
0x141a   :  { %2132 = vrcp.f32 %v1712_v53  ;;  %v1724_v61 = vand.u32 2147483648, %v1712_v53  ;;  %vm1718_vm12 = vweird.f32 %v1712_v53  ;;  %v1722_v62 = vand.u32 2147483647, %v1712_v53 }
0x141c   :  { %v1725_v56 = vor.u32 1.1754944e-38, %v1724_v61  ;;  %vm1723_vm14 = vcmp.eq.f32.partialorder %v1722_v62, 8.507059e+37 }
0x1420   :  { %v2133_v19 = vpop.eup %2132 }
0x1421   :  { %v1714_v54 = vmul.f32 %v2133_v19, %v1712_v53  ;;  %vm1719_vm11 = vweird.f32 %v2133_v19 }
0x1422   :  { %vm1720_vm13 = vmor %vm1718_vm12, %vm1719_vm11 }
0x1423   :  { %v1715_v57 = vsub.f32 1.0, %v1714_v54  ;;  %v1807_v54 = vsel %vm1806_vm10, 1, %v2168_v2 }
0x1425   :  { %v1716_v20 = vmul.f32 %v2133_v19, %v1715_v57 }
0x1427   :  { %v1717_v59 = vadd.f32 %v2133_v19, %v1716_v20 }
0x1429   :  { %v1721_v3 = vsel %vm1720_vm13, %v2133_v19, %v1717_v59 }
0x142a   :  { %v1726_v24 = vsel %vm1723_vm14, %v1725_v56, %v1721_v3 }
0x142b   :  { %v1738_v4 = vsub.f32 1.0, %v1726_v24  ;;  %v1744_v31 = vmul.f32 %v1726_v24, %v2664_v40  ;;  %v1504_v40 = vsel %vm1503_vm2, 1, %v2168_v2 }
0x144d   :  { %v1741_v63 = vpop.permute.xlu1 %1740 }
0x144e   :  { %v1743_v9 = vmul.f32 %v1741_v63, %v1738_v4 }
0x1450   :  { %v1745_v7 = vadd.f32 %v1744_v31, %v1743_v9 }
0x1452   :  { %v1746_v10 = vpack.c.bf16 %v1745_v7, %v1745_v7 }
0x1454   :  { %1748 = vrot.lane.b32.xlu0 %v1746_v10, %s2171_s14 }
0x145c   :  { %661 = vperm.xlu0 %1999, %v659_v12  }
0x1464   :  { %1168 = vperm.xlu0 %1999, %v1166_v60  }
0x146c   :  { %1506 = vperm.xlu0 %1999, %v1504_v40  }
0x1489   :  { %v1647_v14 = vpop.permute.xlu0 %1646 }
0x148a   :  { %v1649_v15 = vmul.f32 %v1647_v14, %v1644_v13 }
0x148c   :  { %v2704_v17 = vadd.f32 %v1650_v8, %v1649_v15 }
0x148e   :  { %v1652_v18 = vpack.c.bf16 %v2704_v17, %v2704_v17 }
0x1490   :  { %1654 = vrot.lane.b32.xlu2 %v1652_v18, %s2171_s14 }
0x14c6   :  { %v1749_v21 = vpop.permute.xlu0 %1748 }
0x14c7   :  { %1975 = vmatmul.msk.bf16.vlgmr.msrb.gmra.mxu3 %vm294_vm0, %v1749_v21 }
0x14ce   :  { %v662_v57 = vpop.permute.xlu0 %661 }
0x14cf   :  { %vm663_vm11 = vcmp.eq.s32.totalorder %v662_v57, 1 }
0x14d0   :  { %v664_v62 = vsel %vm663_vm11, %v2492_v29, 0.0 }
0x14d6   :  { %v1169_v61 = vpop.permute.xlu0 %1168 }
0x14d7   :  { %vm1170_vm14 = vcmp.eq.s32.totalorder %v1169_v61, 1 }
0x14ea   :  { %v1655_v23 = vpop.permute.xlu2 %1654 }
0x14eb   :  { %1972 = vmatmul.msk.bf16.vlgmr.msra.gmra.mxu2 %vm294_vm0, %v1655_v23  ;;  %vm1672_vm0 = vcmp.eq.s32.totalorder %v2694_v11, 6 }
0x14ec   :  { %v1673_v28 = vsel %vm1672_vm0, 1, %v2168_v2  ;;  %v1507_v2 = vpop.permute.xlu0 %1506 }
0x14ed   :  { %vm1508_vm1 = vcmp.eq.s32.totalorder %v1507_v2, 1 }
0x154a   :  { %v1762_v52 = vpop.f32.mrf.mxu3 }
0x1552   :  { %v1764_v6 = vpop.f32.mrf.mxu3 }
0x156e   :  { %v1668_v25 = vpop.f32.mrf.mxu2 }
0x156f   :  { %v1669_v48 = vadd.f32 %v2648_v33, %v1668_v25  ;;  %v1766_v33 = vadd.f32 %v2657_v55, %v1762_v52 }
0x1571   :  { %1788 = vrot.lane.b32.xlu1 %v1669_v48, %s2170_s4  ;;  %v1767_v32 = vadd.f32 %v1766_v33, %v1669_v48 }
0x1573   :  { %v1976_v34 = vmul.f32 -1.442695, %v1767_v32 }
0x1575   :  { %2134 = vpow2.f32 %v1976_v34 }
0x1576   :  { %v1670_v26 = vpop.f32.mrf.mxu2 }
0x1579   :  { %830 = vperm.xlu1 %2000, %v828_v16  }
0x157b   :  { %v2135_v36 = vpop.eup %2134 }
0x157c   :  { %v1771_v37 = vadd.f32 1.0, %v2135_v36 }
0x157e   :  { %2136 = vrcp.f32 %v1771_v37  ;;  %v1783_v45 = vand.u32 2147483648, %v1771_v37  ;;  %vm1777_vm6 = vweird.f32 %v1771_v37  ;;  %v1781_v46 = vand.u32 2147483647, %v1771_v37 }
0x1580   :  { %v1784_v35 = vor.u32 1.1754944e-38, %v1783_v45  ;;  %vm1782_vm8 = vcmp.eq.f32.partialorder %v1781_v46, 8.507059e+37 }
0x1581   :  { %1337 = vperm.xlu1 %2000, %v1335_v27  }
0x1584   :  { %v2137_v38 = vpop.eup %2136 }
0x1585   :  { %v1773_v39 = vmul.f32 %v2137_v38, %v1771_v37  ;;  %vm1778_vm5 = vweird.f32 %v2137_v38 }
0x1586   :  { %vm1779_vm7 = vmor %vm1777_vm6, %vm1778_vm5 }
0x1587   :  { %v1774_v41 = vsub.f32 1.0, %v1773_v39 }
0x1589   :  { %1675 = vperm.xlu1 %2000, %v1673_v28   ;;  %v1775_v43 = vmul.f32 %v2137_v38, %v1774_v41 }
0x158b   :  { %v1776_v44 = vadd.f32 %v2137_v38, %v1775_v43 }
0x158d   :  { %v1780_v47 = vsel %vm1779_vm7, %v2137_v38, %v1776_v44 }
0x158e   :  { %v1785_v42 = vsel %vm1782_vm8, %v1784_v35, %v1780_v47 }
0x158f   :  { %v1798_v9 = vsub.f32 1.0, %v1785_v42  ;;  %v1804_v10 = vmul.f32 %v1785_v42, %v2704_v17 }
0x15e3   :  { %v1789_v55 = vpop.permute.xlu1 %1788 }
0x15e4   :  { %v1791_v50 = vmul.f32 %v1789_v55, %v1785_v42 }
0x15e6   :  { %1793 = vrot.lane.b32.xlu2 %v1791_v50, %s2170_s4  ;;  %s2173_s4 = smov [#allocation3]  }
0x15e7   :  { %s1826_s7 = sshll.u32 %s2173_s4, 4  ;;  %s1827_s7 = int_to_ptr.vmem [resolvable:$true] %s1826_s7 }
0x15eb   :  { %v831_v20 = vpop.permute.xlu1 %830 }
0x15ec   :  { %vm832_vm12 = vcmp.eq.s32.totalorder %v831_v20, 1 }
0x15ed   :  { %v833_v56 = vsel %vm832_vm12, %v2540_v58, %v664_v62 }
0x15ee   :  { %999 = vperm.xlu2 %2001, %v997_v0  }
0x15f3   :  { %v1338_v3 = vpop.permute.xlu1 %1337 }
0x15f4   :  { %vm1339_vm15 = vcmp.eq.s32.totalorder %v1338_v3, 1 }
0x15fb   :  { %v1676_v7 = vpop.permute.xlu1 %1675 }
0x15fc   :  { %vm1677_vm2 = vcmp.eq.s32.totalorder %v1676_v7, 1 }
0x1640   :  { %v1794_v51 = vpop.permute.xlu2 %1793 }
0x1641   :  { %v1796_v53 = vadd.f32 %v1794_v51, %v1766_v33 }
0x1643   :  { %2138 = vtanh.f32 %v1796_v53 }
0x1648   :  { %v1000_v59 = vpop.permute.xlu2 %999 }
0x1649   :  { %v2139_v19 = vpop.eup %2138  ;;  %vm1001_vm13 = vcmp.eq.s32.totalorder %v1000_v59, 1 }
0x164a   :  { %1800 = vrot.lane.b32.xlu2 %v2139_v19, %s2171_s14  ;;  %v1002_v24 = vsel %vm1001_vm13, %v2573_v30, %v833_v56 }
0x164b   :  { %v1171_v4 = vsel %vm1170_vm14, %v2606_v1, %v1002_v24 }
0x164c   :  { %v1340_v31 = vsel %vm1339_vm15, %v2633_v22, %v1171_v4 }
0x164d   :  { %v1509_v29 = vsel %vm1508_vm1, %v2670_v49, %v1340_v31 }
0x164e   :  { %v1678_v30 = vsel %vm1677_vm2, %v2704_v17, %v1509_v29 }
0x1652   :  { %1809 = vperm.xlu2 %2001, %v1807_v54  }
0x16a4   :  { %v1801_v63 = vpop.permute.xlu2 %1800 }
0x16a5   :  { %v1803_v5 = vmul.f32 %v1801_v63, %v1798_v9 }
0x16a7   :  { %v1805_v58 = vadd.f32 %v1804_v10, %v1803_v5 }
0x16ac   :  { %v1810_v11 = vpop.permute.xlu2 %1809 }
0x16ad   :  { %vm1811_vm3 = vcmp.eq.s32.totalorder %v1810_v11, 1 }
0x16ae   :  { %v1812_v1 = vsel %vm1811_vm3, %v1805_v58, %v1678_v30 }
0x16af   :  { %1814 = vrot.lane.b32.xlu0 %v1812_v1, %s2171_s14 }
0x1721   :  { %v1815_v22 = vpop.permute.xlu0 %1814 }
0x1722   :  { %1818 = vst.msk [vmem:[#allocation3] sm:$0x3] %vm1817_vm4, %v1815_v22 }
0x1723   :  { %1831 = dma.vmem_to_hbm [thread:$0]  %s1827_s7, 32, %s1829_s27, [#allocation4]  }
0x1724   :  { %2166 = dma.done.wait [#allocation4], 32  }
0x1725   :  { %2167 = vsyncadd [#allocation4], 4294967264 }
0x1726   :  { %1838 = vsyncpa [#allocation4], 1 }

</bundles_post_ra>
